<compile_context>
chip_gen: v7x
topology: tpu7x:2x2x1
jax: 0.10.0
libtpu: 0.0.40
codegen_flags: <defaults>
</compile_context>

<pallas_src>
import functools
import math

import jax
import jax.numpy as jnp
from jax.experimental import pallas as pl
from jax.experimental.pallas import tpu as pltpu


def _round_up(x, m):
    return (x + m - 1) // m * m


def _device_kind():
    try:
        return jax.devices()[0].device_kind.lower()
    except Exception:
        return ""


def _has_bf16_eup(kind):
    # bf16 VPU/EUP exists from v6e onward; keep f32 exp on v5e and earlier.
    if not kind:
        return False
    return not any(tag in kind for tag in ("v2", "v3", "v4", "v5"))


def _default_row_tile(kind):
    if any(tag in kind for tag in ("v2", "v3", "v4", "v5")):
        return 128      # 16 MiB default scoped VMEM, no bf16 VPU/EUP, 128-deep MXU
    if "v6" in kind:
        return 256      # matches 2x256^2 MXU M-granule, 32 MiB scoped VMEM
    return 128          # v7x / unknown: 64 MiB VMEM per TensorCore


def _vmem_bytes_estimate(H, TR, E, S, D, out_itemsize):
    lane = lambda n: _round_up(n, 128)
    sub = lambda n: _round_up(n, 8)
    bf, f32 = 2, 4
    consts = H * sub(E) * lane(S) * bf               # K^T (resident)
    consts += H * sub(S) * lane(E) * bf              # V   (resident)
    consts += H * sub(E) * lane(D) * bf              # Wo  (resident)
    consts += sub(1) * lane(D) * f32                 # bias
    moving = 2 * H * sub(TR) * lane(E) * bf          # q tile, double-buffered
    moving += 2 * sub(TR) * lane(D) * out_itemsize   # out tile, double-buffered
    interm = H * sub(TR) * lane(S) * (f32 + bf)      # scores f32 + exp bf16
    interm += H * sub(TR) * lane(E) * (f32 + bf)     # ctx f32 + bf16
    interm += sub(TR) * lane(D) * f32                # projection accumulator
    return consts + moving + interm


def _reprogramming_attn_kernel(q_ref, kT_ref, v_ref, wo_ref, bo_ref, out_ref,
                               *, exp_in_bf16):
    """One grid step handles one tile of rows.

    q_ref  : (H, TR, E)     bf16  (already scaled by 1/sqrt(E))
    kT_ref : (H, E, S)      bf16  (grid-constant)
    v_ref  : (H, S, E)      bf16  (grid-constant)
    wo_ref : (H, E, d_llm)  bf16  (grid-constant)
    bo_ref : (1, d_llm)     f32   (grid-constant)
    out_ref: (TR, d_llm)
    """
    q = q_ref[...]                      # (H, TR, E) bf16
    kT = kT_ref[...]                    # (H, E, S)  bf16

    # Head-batched scores: (H, TR, S), f32 accumulation on the MXU.
    scores = jnp.einsum('hte,hes->hts', q, kT,
                        preferred_element_type=jnp.float32)

    # Softmax over S with DEFERRED normalization: unnormalized exp weights go
    # straight (bf16) into the V matmul; 1/sum is applied to the small context.
    m = jnp.max(scores, axis=-1, keepdims=True)
    x = scores - m
    if exp_in_bf16:
        # bf16 EUP path (v6e+): doubles exp throughput; denom accumulated in f32.
        p = jnp.exp(x.astype(jnp.bfloat16))                          # (H,TR,S)
        denom = jnp.sum(p.astype(jnp.float32), axis=-1, keepdims=True)
    else:
        p32 = jnp.exp(x)
        denom = jnp.sum(p32, axis=-1, keepdims=True)
        p = p32.astype(jnp.bfloat16)                                 # (H,TR,S)
    inv = pl.reciprocal(denom, approx=True)                          # (H,TR,1)

    # Unnormalized context, then the cheap (H,TR,E) normalization multiply.
    ctx = jnp.einsum('hts,hse->hte', p, v_ref[...],
                     preferred_element_type=jnp.float32)             # (H,TR,E)
    ctx = (ctx * inv).astype(jnp.bfloat16)

    # Output projection: accumulate per-head dots directly into one
    # (TR, d_llm) f32 tile — no (H, TR, d_llm) intermediate, no H-way reduce.
    # TODO(synk): a true single K=H*E matmul needs a (TR,H,E)->(TR,H*E)
    # minor-dim reshape Mosaic does not lower cleanly; approximated here.
    H = q.shape[0]
    acc = jnp.dot(ctx[0], wo_ref[0], preferred_element_type=jnp.float32)
    for h in range(1, H):
        acc = acc + jnp.dot(ctx[h], wo_ref[h],
                            preferred_element_type=jnp.float32)
    out_ref[...] = (acc + bo_ref[...]).astype(out_ref.dtype)


def reprogramming_layer(target_embedding, source_embedding, value_embedding,
                        params, *, n_heads, row_tile=None,
                        out_dtype=jnp.float32):
    """Pallas forward for ReprogrammingLayer (inference / eval mode).

    out_dtype=jnp.bfloat16 halves kernel output writeback if downstream
    accepts bf16; default f32 matches the torch module's dtype.
    """
    B, L, d_model = target_embedding.shape
    S, d_llm = source_embedding.shape
    wq, bq, wk, bk, wv, bv, wo, bo = params
    d_hidden = wq.shape[1]              # d_keys * n_heads
    H = n_heads
    E = d_hidden // H
    scale = 1.0 / math.sqrt(E)

    kind = _device_kind()
    exp_in_bf16 = _has_bf16_eup(kind)

    # ---- Hoisted projections (plain XLA GEMMs, f32) ----
    k = source_embedding @ wk + bk                     # (S, H*E), batch-invariant
    v = value_embedding @ wv + bv                      # (S, H*E), batch-invariant
    q = (target_embedding.reshape(B * L, d_model) @ wq + bq) * scale   # (N, H*E)

    # Head-major layouts for the kernel (bf16 MXU operands).
    kT_h = jnp.transpose(k.reshape(S, H, E), (1, 2, 0)).astype(jnp.bfloat16)  # (H,E,S)
    v_h = jnp.transpose(v.reshape(S, H, E), (1, 0, 2)).astype(jnp.bfloat16)   # (H,S,E)
    wo_h = wo.reshape(H, E, d_llm).astype(jnp.bfloat16)                       # (H,E,d_llm)
    bo2 = bo.reshape(1, d_llm).astype(jnp.float32)                            # (1,d_llm)

    # ---- Row tiling (flatten B*L; tiles are multiples of 16 for bf16 packing) ----
    N = B * L
    N16 = _round_up(N, 16)
    if row_tile is None:
        row_tile = _default_row_tile(kind)
    TR = min(_round_up(row_tile, 16), N16)
    # Keep >= 2 grid steps so the "parallel" axis can shard across both v7x
    # TensorCores (negligible extra overhead on single-TC v5e/v6e).
    if N16 // TR < 2 and N16 >= 32:
        TR = max(16, _round_up(N16 // 2, 16))
    N_pad = _round_up(N, TR)

    q_h = jnp.transpose(q.reshape(N, H, E), (1, 0, 2))                        # (H,N,E)
    if N_pad != N:
        q_h = jnp.pad(q_h, ((0, 0), (0, N_pad - N), (0, 0)))
    q_h = q_h.astype(jnp.bfloat16)

    out_itemsize = jnp.dtype(out_dtype).itemsize
    est = _vmem_bytes_estimate(H, TR, E, S, d_llm, out_itemsize)
    vmem_limit = int(min(max(2 * est, 32 * 1024 * 1024), 96 * 1024 * 1024))

    grid = (N_pad // TR,)
    c3 = lambda i: (0, 0, 0)
    c2 = lambda i: (0, 0)

    def make_call(single_buffer_consts, exp_bf16):
        kernel = functools.partial(_reprogramming_attn_kernel,
                                   exp_in_bf16=exp_bf16)
        # Grid-constant operands: single-buffered (default pipelining would
        # waste a second VMEM copy on revisited constants).
        kw = dict(pipeline_mode=pl.Buffered(1)) if single_buffer_consts else {}
        return pl.pallas_call(
            kernel,
            out_shape=jax.ShapeDtypeStruct((N_pad, d_llm), out_dtype),
            grid_spec=pltpu.PrefetchScalarGridSpec(
                num_scalar_prefetch=0,
                grid=grid,
                in_specs=[
                    pl.BlockSpec((H, TR, E), lambda i: (0, i, 0)),    # q tile
                    pl.BlockSpec((H, E, S), c3, **kw),                # K^T (const)
                    pl.BlockSpec((H, S, E), c3, **kw),                # V   (const)
                    pl.BlockSpec((H, E, d_llm), c3, **kw),            # Wo  (const)
                    pl.BlockSpec((1, d_llm), c2, **kw),               # bo  (const)
                ],
                out_specs=pl.BlockSpec((TR, d_llm), lambda i: (i, 0)),
            ),
            compiler_params=pltpu.CompilerParams(
                dimension_semantics=("parallel",),
                vmem_limit_bytes=vmem_limit),
        )

    try:
        out = make_call(True, exp_in_bf16)(q_h, kT_h, v_h, wo_h, bo2)
    except Exception:
        # Conservative fallback (older jax without BlockSpec.pipeline_mode /
        # no bf16 exp lowering): double-buffered constants, f32 exp.
        out = make_call(False, False)(q_h, kT_h, v_h, wo_h, bo2)

    return out[:N].reshape(B, L, d_llm)


def reprogramming_layer_ref(target_embedding, source_embedding, value_embedding,
                            params, *, n_heads):
    """Pure-JAX f32 reference mirroring the PyTorch forward (eval mode)."""
    B, L, _ = target_embedding.shape
    S, _ = source_embedding.shape
    wq, bq, wk, bk, wv, bv, wo, bo = params
    H = n_heads
    q = (target_embedding @ wq + bq).reshape(B, L, H, -1)
    k = (source_embedding @ wk + bk).reshape(S, H, -1)
    v = (value_embedding @ wv + bv).reshape(S, H, -1)
    E = q.shape[-1]
    scores = jnp.einsum('blhe,she->bhls', q, k)
    A = jax.nn.softmax(scores / math.sqrt(E), axis=-1)
    out = jnp.einsum('bhls,she->blhe', A, v).reshape(B, L, -1)
    return out @ wo + bo


if __name__ == "__main__":
    # Small shapes consistent with the module (d_llm kept lane-dense = 128).
    B, L, S = 2, 16, 32
    d_model, n_heads, d_llm = 32, 4, 128
    d_keys = d_model // n_heads          # 8
    d_hidden = d_keys * n_heads          # 32

    key = jax.random.PRNGKey(0)
    keys = jax.random.split(key, 12)

    def init_w(k, shape, fan_in):
        bound = 1.0 / math.sqrt(fan_in)
        return jax.random.uniform(k, shape, jnp.float32, -bound, bound)

    target = jax.random.normal(keys[0], (B, L, d_model), jnp.float32)
    source = jax.random.normal(keys[1], (S, d_llm), jnp.float32)
    value = jax.random.normal(keys[2], (S, d_llm), jnp.float32)

    wq = init_w(keys[3], (d_model, d_hidden), d_model)
    bq = init_w(keys[4], (1, d_hidden), d_model)
    wk = init_w(keys[5], (d_llm, d_hidden), d_llm)
    bk = init_w(keys[6], (1, d_hidden), d_llm)
    wv = init_w(keys[7], (d_llm, d_hidden), d_llm)
    bv = init_w(keys[8], (1, d_hidden), d_llm)
    wo = init_w(keys[9], (d_hidden, d_llm), d_hidden)
    bo = init_w(keys[10], (1, d_llm), d_hidden)
    params = (wq, bq, wk, bk, wv, bv, wo, bo)

    # Auto tile selection: at these toy shapes it yields TR=16 and a 2-step
    # grid (exercises the pipeline and the >=2-step megacore rule).
    out = reprogramming_layer(target, source, value, params, n_heads=n_heads)
    out = jax.block_until_ready(out)

    ref = reprogramming_layer_ref(target, source, value, params, n_heads=n_heads)
    if out.shape != ref.shape:
        raise AssertionError(f"shape mismatch: {out.shape} vs {ref.shape}")
    # bf16 MXU operands, bf16 exp (v6e+), approx reciprocal -> loosened
    # tolerance vs the f32 reference (inference-grade numerics).
    if not jnp.allclose(out, ref, atol=5e-2, rtol=5e-2):
        err = float(jnp.max(jnp.abs(out - ref)))
        raise AssertionError(f"Pallas kernel output mismatch vs JAX reference "
                             f"(max abs err {err:.4e})")

    print("KERNEL_OK")
</pallas_src>

<mosaic_0001>
module attributes {stable_mosaic.version = 11 : i64} {
  func.func @_reprogramming_attn_kernel(%arg0: i32, %arg1: memref<4x16x8xbf16, #tpu.memory_space<vmem>>, %arg2: memref<4x8x32xbf16, #tpu.memory_space<vmem>>, %arg3: memref<4x32x8xbf16, #tpu.memory_space<vmem>>, %arg4: memref<4x8x128xbf16, #tpu.memory_space<vmem>>, %arg5: memref<1x128xf32, #tpu.memory_space<vmem>>, %arg6: memref<16x128xf32, #tpu.memory_space<vmem>>) attributes {dimension_semantics = [#tpu.dimension_semantics<parallel>], iteration_bounds = array<i64: 2>, scalar_prefetch = 0 : i64, scratch_operands = 0 : i64, tpu.core_type = #tpu.core_type<tc>, window_params = [{transform_indices = @transform_0, window_bounds = array<i64: 4, 16, 8>}, {pipeline_mode = #tpu.pipeline_mode<synchronous>, transform_indices = @transform_1, window_bounds = array<i64: 4, 8, 32>}, {pipeline_mode = #tpu.pipeline_mode<synchronous>, transform_indices = @transform_2, window_bounds = array<i64: 4, 32, 8>}, {pipeline_mode = #tpu.pipeline_mode<synchronous>, transform_indices = @transform_3, window_bounds = array<i64: 4, 8, 128>}, {pipeline_mode = #tpu.pipeline_mode<synchronous>, transform_indices = @transform_4, window_bounds = array<i64: 1, 128>}, {transform_indices = @transform_5, window_bounds = array<i64: 16, 128>}]} {
    %c0 = arith.constant 0 : index
    %c0_0 = arith.constant 0 : index
    %c0_1 = arith.constant 0 : index
    %0 = vector.load %arg1[%c0, %c0_0, %c0_1] : memref<4x16x8xbf16, #tpu.memory_space<vmem>>, vector<4x16x8xbf16>
    %c0_2 = arith.constant 0 : index
    %c0_3 = arith.constant 0 : index
    %c0_4 = arith.constant 0 : index
    %1 = vector.load %arg2[%c0_2, %c0_3, %c0_4] : memref<4x8x32xbf16, #tpu.memory_space<vmem>>, vector<4x8x32xbf16>
    "tpu.trace_start"() <{level = 10 : i32, message = "hte,hes->hts"}> : () -> ()
    %cst = arith.constant dense<0.000000e+00> : vector<4x16x32xf32>
    %2 = tpu.matmul %0, %1, %cst {dimension_numbers = #tpu.dot_dimension_numbers<[2], [1], [1], [2], [0, 0, 0, 1, 1, 2], [0], [0]>} : vector<4x16x8xbf16>, vector<4x8x32xbf16>, vector<4x16x32xf32> -> vector<4x16x32xf32>
    "tpu.trace_stop"() : () -> ()
    %cst_5 = arith.constant dense<0xFF800000> : vector<4x16xf32>
    %3 = vector.multi_reduction <maximumf>, %2, %cst_5 [2] : vector<4x16x32xf32> to vector<4x16xf32>
    %4 = vector.shape_cast %3 : vector<4x16xf32> to vector<4x16x1xf32>
    %5 = vector.broadcast %4 : vector<4x16x1xf32> to vector<4x16x32xf32>
    %6 = arith.subf %2, %5 : vector<4x16x32xf32>
    %7 = arith.truncf %6 : vector<4x16x32xf32> to vector<4x16x32xbf16>
    %8 = math.exp %7 : vector<4x16x32xbf16>
    %9 = arith.extf %8 : vector<4x16x32xbf16> to vector<4x16x32xf32>
    %cst_6 = arith.constant dense<0.000000e+00> : vector<4x16xf32>
    %10 = vector.multi_reduction <add>, %9, %cst_6 [2] : vector<4x16x32xf32> to vector<4x16xf32>
    %11 = vector.shape_cast %10 : vector<4x16xf32> to vector<4x16x1xf32>
    %12 = tpu.reciprocal %11 {approx = true} : vector<4x16x1xf32> -> vector<4x16x1xf32>
    %c0_7 = arith.constant 0 : index
    %c0_8 = arith.constant 0 : index
    %c0_9 = arith.constant 0 : index
    %13 = vector.load %arg3[%c0_7, %c0_8, %c0_9] : memref<4x32x8xbf16, #tpu.memory_space<vmem>>, vector<4x32x8xbf16>
    "tpu.trace_start"() <{level = 10 : i32, message = "hts,hse->hte"}> : () -> ()
    %cst_10 = arith.constant dense<0.000000e+00> : vector<4x16x8xf32>
    %14 = tpu.matmul %8, %13, %cst_10 {dimension_numbers = #tpu.dot_dimension_numbers<[2], [1], [1], [2], [0, 0, 0, 1, 1, 2], [0], [0]>} : vector<4x16x32xbf16>, vector<4x32x8xbf16>, vector<4x16x8xf32> -> vector<4x16x8xf32>
    "tpu.trace_stop"() : () -> ()
    %15 = vector.broadcast %12 : vector<4x16x1xf32> to vector<4x16x8xf32>
    %16 = arith.mulf %14, %15 : vector<4x16x8xf32>
    %17 = arith.truncf %16 : vector<4x16x8xf32> to vector<4x16x8xbf16>
    %18 = vector.extract_strided_slice %17 {offsets = [0, 0, 0], sizes = [1, 16, 8], strides = [1, 1, 1]} : vector<4x16x8xbf16> to vector<1x16x8xbf16>
    %19 = vector.shape_cast %18 : vector<1x16x8xbf16> to vector<16x8xbf16>
    %c0_11 = arith.constant 0 : index
    %c0_12 = arith.constant 0 : index
    %c0_13 = arith.constant 0 : index
    %20 = vector.load %arg4[%c0_11, %c0_12, %c0_13] : memref<4x8x128xbf16, #tpu.memory_space<vmem>>, vector<1x8x128xbf16>
    %21 = vector.shape_cast %20 : vector<1x8x128xbf16> to vector<8x128xbf16>
    %cst_14 = arith.constant dense<0.000000e+00> : vector<16x128xf32>
    %22 = tpu.matmul %19, %21, %cst_14 {dimension_numbers = #tpu.dot_dimension_numbers<[1], [0], [0], [1], [0, 0, 1, 1], [], []>} : vector<16x8xbf16>, vector<8x128xbf16>, vector<16x128xf32> -> vector<16x128xf32>
    %23 = vector.extract_strided_slice %17 {offsets = [1, 0, 0], sizes = [1, 16, 8], strides = [1, 1, 1]} : vector<4x16x8xbf16> to vector<1x16x8xbf16>
    %24 = vector.shape_cast %23 : vector<1x16x8xbf16> to vector<16x8xbf16>
    %c1 = arith.constant 1 : index
    %c0_15 = arith.constant 0 : index
    %c0_16 = arith.constant 0 : index
    %25 = vector.load %arg4[%c1, %c0_15, %c0_16] : memref<4x8x128xbf16, #tpu.memory_space<vmem>>, vector<1x8x128xbf16>
    %26 = vector.shape_cast %25 : vector<1x8x128xbf16> to vector<8x128xbf16>
    %cst_17 = arith.constant dense<0.000000e+00> : vector<16x128xf32>
    %27 = tpu.matmul %24, %26, %cst_17 {dimension_numbers = #tpu.dot_dimension_numbers<[1], [0], [0], [1], [0, 0, 1, 1], [], []>} : vector<16x8xbf16>, vector<8x128xbf16>, vector<16x128xf32> -> vector<16x128xf32>
    %28 = arith.addf %22, %27 : vector<16x128xf32>
    %29 = vector.extract_strided_slice %17 {offsets = [2, 0, 0], sizes = [1, 16, 8], strides = [1, 1, 1]} : vector<4x16x8xbf16> to vector<1x16x8xbf16>
    %30 = vector.shape_cast %29 : vector<1x16x8xbf16> to vector<16x8xbf16>
    %c2 = arith.constant 2 : index
    %c0_18 = arith.constant 0 : index
    %c0_19 = arith.constant 0 : index
    %31 = vector.load %arg4[%c2, %c0_18, %c0_19] : memref<4x8x128xbf16, #tpu.memory_space<vmem>>, vector<1x8x128xbf16>
    %32 = vector.shape_cast %31 : vector<1x8x128xbf16> to vector<8x128xbf16>
    %cst_20 = arith.constant dense<0.000000e+00> : vector<16x128xf32>
    %33 = tpu.matmul %30, %32, %cst_20 {dimension_numbers = #tpu.dot_dimension_numbers<[1], [0], [0], [1], [0, 0, 1, 1], [], []>} : vector<16x8xbf16>, vector<8x128xbf16>, vector<16x128xf32> -> vector<16x128xf32>
    %34 = arith.addf %28, %33 : vector<16x128xf32>
    %35 = vector.extract_strided_slice %17 {offsets = [3, 0, 0], sizes = [1, 16, 8], strides = [1, 1, 1]} : vector<4x16x8xbf16> to vector<1x16x8xbf16>
    %36 = vector.shape_cast %35 : vector<1x16x8xbf16> to vector<16x8xbf16>
    %c3 = arith.constant 3 : index
    %c0_21 = arith.constant 0 : index
    %c0_22 = arith.constant 0 : index
    %37 = vector.load %arg4[%c3, %c0_21, %c0_22] : memref<4x8x128xbf16, #tpu.memory_space<vmem>>, vector<1x8x128xbf16>
    %38 = vector.shape_cast %37 : vector<1x8x128xbf16> to vector<8x128xbf16>
    %cst_23 = arith.constant dense<0.000000e+00> : vector<16x128xf32>
    %39 = tpu.matmul %36, %38, %cst_23 {dimension_numbers = #tpu.dot_dimension_numbers<[1], [0], [0], [1], [0, 0, 1, 1], [], []>} : vector<16x8xbf16>, vector<8x128xbf16>, vector<16x128xf32> -> vector<16x128xf32>
    %40 = arith.addf %34, %39 : vector<16x128xf32>
    %c0_24 = arith.constant 0 : index
    %c0_25 = arith.constant 0 : index
    %41 = vector.load %arg5[%c0_24, %c0_25] : memref<1x128xf32, #tpu.memory_space<vmem>>, vector<1x128xf32>
    %42 = vector.broadcast %41 : vector<1x128xf32> to vector<16x128xf32>
    %43 = arith.addf %40, %42 : vector<16x128xf32>
    %c0_26 = arith.constant 0 : index
    %c0_27 = arith.constant 0 : index
    %44 = vector.load %arg6[%c0_26, %c0_27] : memref<16x128xf32, #tpu.memory_space<vmem>>, vector<16x128xf32>
    tpu.vector_store %arg6[%c0_26, %c0_27], %43 {strides = array<i32>} : memref<16x128xf32, #tpu.memory_space<vmem>>, vector<16x128xf32>,
    return
  }
  func.func @transform_0(%arg0: i32) -> (i32, i32, i32) {
    %c0_i32 = arith.constant 0 : i32
    %c0_i32_0 = arith.constant 0 : i32
    %c0_i32_1 = arith.constant 0 : i32
    return %c0_i32, %arg0, %c0_i32_0 : i32, i32, i32
  }
  func.func @transform_1(%arg0: i32) -> (i32, i32, i32) {
    %c0_i32 = arith.constant 0 : i32
    %c0_i32_0 = arith.constant 0 : i32
    %c0_i32_1 = arith.constant 0 : i32
    %c0_i32_2 = arith.constant 0 : i32
    return %c0_i32, %c0_i32_0, %c0_i32_1 : i32, i32, i32
  }
  func.func @transform_2(%arg0: i32) -> (i32, i32, i32) {
    %c0_i32 = arith.constant 0 : i32
    %c0_i32_0 = arith.constant 0 : i32
    %c0_i32_1 = arith.constant 0 : i32
    %c0_i32_2 = arith.constant 0 : i32
    return %c0_i32, %c0_i32_0, %c0_i32_1 : i32, i32, i32
  }
  func.func @transform_3(%arg0: i32) -> (i32, i32, i32) {
    %c0_i32 = arith.constant 0 : i32
    %c0_i32_0 = arith.constant 0 : i32
    %c0_i32_1 = arith.constant 0 : i32
    %c0_i32_2 = arith.constant 0 : i32
    return %c0_i32, %c0_i32_0, %c0_i32_1 : i32, i32, i32
  }
  func.func @transform_4(%arg0: i32) -> (i32, i32) {
    %c0_i32 = arith.constant 0 : i32
    %c0_i32_0 = arith.constant 0 : i32
    %c0_i32_1 = arith.constant 0 : i32
    return %c0_i32, %c0_i32_0 : i32, i32
  }
  func.func @transform_5(%arg0: i32) -> (i32, i32) {
    %c0_i32 = arith.constant 0 : i32
    %c0_i32_0 = arith.constant 0 : i32
    return %arg0, %c0_i32 : i32, i32
  }
}

module attributes {stable_mosaic.version = 11 : i64} {
  func.func @_reprogramming_attn_kernel(%arg0: i32, %arg1: memref<4x16x8xbf16, #tpu.memory_space<vmem>>, %arg2: memref<4x8x32xbf16, #tpu.memory_space<vmem>>, %arg3: memref<4x32x8xbf16, #tpu.memory_space<vmem>>, %arg4: memref<4x8x128xbf16, #tpu.memory_space<vmem>>, %arg5: memref<1x128xf32, #tpu.memory_space<vmem>>, %arg6: memref<16x128xf32, #tpu.memory_space<vmem>>) attributes {dimension_semantics = [#tpu.dimension_semantics<parallel>], iteration_bounds = array<i64: 2>, scalar_prefetch = 0 : i64, scratch_operands = 0 : i64, tpu.core_type = #tpu.core_type<tc>, window_params = [{transform_indices = @transform_0, window_bounds = array<i64: 4, 16, 8>}, {pipeline_mode = #tpu.pipeline_mode<synchronous>, transform_indices = @transform_1, window_bounds = array<i64: 4, 8, 32>}, {pipeline_mode = #tpu.pipeline_mode<synchronous>, transform_indices = @transform_2, window_bounds = array<i64: 4, 32, 8>}, {pipeline_mode = #tpu.pipeline_mode<synchronous>, transform_indices = @transform_3, window_bounds = array<i64: 4, 8, 128>}, {pipeline_mode = #tpu.pipeline_mode<synchronous>, transform_indices = @transform_4, window_bounds = array<i64: 1, 128>}, {transform_indices = @transform_5, window_bounds = array<i64: 16, 128>}]} {
    %c0 = arith.constant 0 : index
    %c0_0 = arith.constant 0 : index
    %c0_1 = arith.constant 0 : index
    %0 = vector.load %arg1[%c0, %c0_0, %c0_1] : memref<4x16x8xbf16, #tpu.memory_space<vmem>>, vector<4x16x8xbf16>
    %c0_2 = arith.constant 0 : index
    %c0_3 = arith.constant 0 : index
    %c0_4 = arith.constant 0 : index
    %1 = vector.load %arg2[%c0_2, %c0_3, %c0_4] : memref<4x8x32xbf16, #tpu.memory_space<vmem>>, vector<4x8x32xbf16>
    "tpu.trace_start"() <{level = 10 : i32, message = "hte,hes->hts"}> : () -> ()
    %cst = arith.constant dense<0.000000e+00> : vector<4x16x32xf32>
    %2 = tpu.matmul %0, %1, %cst {dimension_numbers = #tpu.dot_dimension_numbers<[2], [1], [1], [2], [0, 0, 0, 1, 1, 2], [0], [0]>} : vector<4x16x8xbf16>, vector<4x8x32xbf16>, vector<4x16x32xf32> -> vector<4x16x32xf32>
    "tpu.trace_stop"() : () -> ()
    %cst_5 = arith.constant dense<0xFF800000> : vector<4x16xf32>
    %3 = vector.multi_reduction <maximumf>, %2, %cst_5 [2] : vector<4x16x32xf32> to vector<4x16xf32>
    %4 = vector.shape_cast %3 : vector<4x16xf32> to vector<4x16x1xf32>
    %5 = vector.broadcast %4 : vector<4x16x1xf32> to vector<4x16x32xf32>
    %6 = arith.subf %2, %5 : vector<4x16x32xf32>
    %7 = math.exp %6 : vector<4x16x32xf32>
    %cst_6 = arith.constant dense<0.000000e+00> : vector<4x16xf32>
    %8 = vector.multi_reduction <add>, %7, %cst_6 [2] : vector<4x16x32xf32> to vector<4x16xf32>
    %9 = vector.shape_cast %8 : vector<4x16xf32> to vector<4x16x1xf32>
    %10 = arith.truncf %7 : vector<4x16x32xf32> to vector<4x16x32xbf16>
    %11 = tpu.reciprocal %9 {approx = true} : vector<4x16x1xf32> -> vector<4x16x1xf32>
    %c0_7 = arith.constant 0 : index
    %c0_8 = arith.constant 0 : index
    %c0_9 = arith.constant 0 : index
    %12 = vector.load %arg3[%c0_7, %c0_8, %c0_9] : memref<4x32x8xbf16, #tpu.memory_space<vmem>>, vector<4x32x8xbf16>
    "tpu.trace_start"() <{level = 10 : i32, message = "hts,hse->hte"}> : () -> ()
    %cst_10 = arith.constant dense<0.000000e+00> : vector<4x16x8xf32>
    %13 = tpu.matmul %10, %12, %cst_10 {dimension_numbers = #tpu.dot_dimension_numbers<[2], [1], [1], [2], [0, 0, 0, 1, 1, 2], [0], [0]>} : vector<4x16x32xbf16>, vector<4x32x8xbf16>, vector<4x16x8xf32> -> vector<4x16x8xf32>
    "tpu.trace_stop"() : () -> ()
    %14 = vector.broadcast %11 : vector<4x16x1xf32> to vector<4x16x8xf32>
    %15 = arith.mulf %13, %14 : vector<4x16x8xf32>
    %16 = arith.truncf %15 : vector<4x16x8xf32> to vector<4x16x8xbf16>
    %17 = vector.extract_strided_slice %16 {offsets = [0, 0, 0], sizes = [1, 16, 8], strides = [1, 1, 1]} : vector<4x16x8xbf16> to vector<1x16x8xbf16>
    %18 = vector.shape_cast %17 : vector<1x16x8xbf16> to vector<16x8xbf16>
    %c0_11 = arith.constant 0 : index
    %c0_12 = arith.constant 0 : index
    %c0_13 = arith.constant 0 : index
    %19 = vector.load %arg4[%c0_11, %c0_12, %c0_13] : memref<4x8x128xbf16, #tpu.memory_space<vmem>>, vector<1x8x128xbf16>
    %20 = vector.shape_cast %19 : vector<1x8x128xbf16> to vector<8x128xbf16>
    %cst_14 = arith.constant dense<0.000000e+00> : vector<16x128xf32>
    %21 = tpu.matmul %18, %20, %cst_14 {dimension_numbers = #tpu.dot_dimension_numbers<[1], [0], [0], [1], [0, 0, 1, 1], [], []>} : vector<16x8xbf16>, vector<8x128xbf16>, vector<16x128xf32> -> vector<16x128xf32>
    %22 = vector.extract_strided_slice %16 {offsets = [1, 0, 0], sizes = [1, 16, 8], strides = [1, 1, 1]} : vector<4x16x8xbf16> to vector<1x16x8xbf16>
    %23 = vector.shape_cast %22 : vector<1x16x8xbf16> to vector<16x8xbf16>
    %c1 = arith.constant 1 : index
    %c0_15 = arith.constant 0 : index
    %c0_16 = arith.constant 0 : index
    %24 = vector.load %arg4[%c1, %c0_15, %c0_16] : memref<4x8x128xbf16, #tpu.memory_space<vmem>>, vector<1x8x128xbf16>
    %25 = vector.shape_cast %24 : vector<1x8x128xbf16> to vector<8x128xbf16>
    %cst_17 = arith.constant dense<0.000000e+00> : vector<16x128xf32>
    %26 = tpu.matmul %23, %25, %cst_17 {dimension_numbers = #tpu.dot_dimension_numbers<[1], [0], [0], [1], [0, 0, 1, 1], [], []>} : vector<16x8xbf16>, vector<8x128xbf16>, vector<16x128xf32> -> vector<16x128xf32>
    %27 = arith.addf %21, %26 : vector<16x128xf32>
    %28 = vector.extract_strided_slice %16 {offsets = [2, 0, 0], sizes = [1, 16, 8], strides = [1, 1, 1]} : vector<4x16x8xbf16> to vector<1x16x8xbf16>
    %29 = vector.shape_cast %28 : vector<1x16x8xbf16> to vector<16x8xbf16>
    %c2 = arith.constant 2 : index
    %c0_18 = arith.constant 0 : index
    %c0_19 = arith.constant 0 : index
    %30 = vector.load %arg4[%c2, %c0_18, %c0_19] : memref<4x8x128xbf16, #tpu.memory_space<vmem>>, vector<1x8x128xbf16>
    %31 = vector.shape_cast %30 : vector<1x8x128xbf16> to vector<8x128xbf16>
    %cst_20 = arith.constant dense<0.000000e+00> : vector<16x128xf32>
    %32 = tpu.matmul %29, %31, %cst_20 {dimension_numbers = #tpu.dot_dimension_numbers<[1], [0], [0], [1], [0, 0, 1, 1], [], []>} : vector<16x8xbf16>, vector<8x128xbf16>, vector<16x128xf32> -> vector<16x128xf32>
    %33 = arith.addf %27, %32 : vector<16x128xf32>
    %34 = vector.extract_strided_slice %16 {offsets = [3, 0, 0], sizes = [1, 16, 8], strides = [1, 1, 1]} : vector<4x16x8xbf16> to vector<1x16x8xbf16>
    %35 = vector.shape_cast %34 : vector<1x16x8xbf16> to vector<16x8xbf16>
    %c3 = arith.constant 3 : index
    %c0_21 = arith.constant 0 : index
    %c0_22 = arith.constant 0 : index
    %36 = vector.load %arg4[%c3, %c0_21, %c0_22] : memref<4x8x128xbf16, #tpu.memory_space<vmem>>, vector<1x8x128xbf16>
    %37 = vector.shape_cast %36 : vector<1x8x128xbf16> to vector<8x128xbf16>
    %cst_23 = arith.constant dense<0.000000e+00> : vector<16x128xf32>
    %38 = tpu.matmul %35, %37, %cst_23 {dimension_numbers = #tpu.dot_dimension_numbers<[1], [0], [0], [1], [0, 0, 1, 1], [], []>} : vector<16x8xbf16>, vector<8x128xbf16>, vector<16x128xf32> -> vector<16x128xf32>
    %39 = arith.addf %33, %38 : vector<16x128xf32>
    %c0_24 = arith.constant 0 : index
    %c0_25 = arith.constant 0 : index
    %40 = vector.load %arg5[%c0_24, %c0_25] : memref<1x128xf32, #tpu.memory_space<vmem>>, vector<1x128xf32>
    %41 = vector.broadcast %40 : vector<1x128xf32> to vector<16x128xf32>
    %42 = arith.addf %39, %41 : vector<16x128xf32>
    %c0_26 = arith.constant 0 : index
    %c0_27 = arith.constant 0 : index
    %43 = vector.load %arg6[%c0_26, %c0_27] : memref<16x128xf32, #tpu.memory_space<vmem>>, vector<16x128xf32>
    tpu.vector_store %arg6[%c0_26, %c0_27], %42 {strides = array<i32>} : memref<16x128xf32, #tpu.memory_space<vmem>>, vector<16x128xf32>,
    return
  }
  func.func @transform_0(%arg0: i32) -> (i32, i32, i32) {
    %c0_i32 = arith.constant 0 : i32
    %c0_i32_0 = arith.constant 0 : i32
    %c0_i32_1 = arith.constant 0 : i32
    return %c0_i32, %arg0, %c0_i32_0 : i32, i32, i32
  }
  func.func @transform_1(%arg0: i32) -> (i32, i32, i32) {
    %c0_i32 = arith.constant 0 : i32
    %c0_i32_0 = arith.constant 0 : i32
    %c0_i32_1 = arith.constant 0 : i32
    %c0_i32_2 = arith.constant 0 : i32
    return %c0_i32, %c0_i32_0, %c0_i32_1 : i32, i32, i32
  }
  func.func @transform_2(%arg0: i32) -> (i32, i32, i32) {
    %c0_i32 = arith.constant 0 : i32
    %c0_i32_0 = arith.constant 0 : i32
    %c0_i32_1 = arith.constant 0 : i32
    %c0_i32_2 = arith.constant 0 : i32
    return %c0_i32, %c0_i32_0, %c0_i32_1 : i32, i32, i32
  }
  func.func @transform_3(%arg0: i32) -> (i32, i32, i32) {
    %c0_i32 = arith.constant 0 : i32
    %c0_i32_0 = arith.constant 0 : i32
    %c0_i32_1 = arith.constant 0 : i32
    %c0_i32_2 = arith.constant 0 : i32
    return %c0_i32, %c0_i32_0, %c0_i32_1 : i32, i32, i32
  }
  func.func @transform_4(%arg0: i32) -> (i32, i32) {
    %c0_i32 = arith.constant 0 : i32
    %c0_i32_0 = arith.constant 0 : i32
    %c0_i32_1 = arith.constant 0 : i32
    return %c0_i32, %c0_i32_0 : i32, i32
  }
  func.func @transform_5(%arg0: i32) -> (i32, i32) {
    %c0_i32 = arith.constant 0 : i32
    %c0_i32_0 = arith.constant 0 : i32
    return %arg0, %c0_i32 : i32, i32
  }
}

</mosaic_0001>

<bundles_post_ra>
// kernel: tpu_custom_call.1
= control target key start
LH: loop header
LB: loop body
LE: loop exit
PB: predicated region body
PF: predicated region fallthrough
CT: control target
= control target key end

     0   :  { %10 = vsyncpa [#allocation4], 0  ;;  %s1720_s0 = inlined_call_operand.vmem [shape: bf16[4,32,8], index: 0, kind: input, shape index: {}]   ;;  %s1721_s1 = inlined_call_operand.vmem [shape: bf16[4,8,32], index: 1, kind: input, shape index: {}]   ;;  %s1722_s2 = inlined_call_operand.vmem [shape: bf16[4,32,8], index: 2, kind: input, shape index: {}]   ;;  %s1723_s3 = inlined_call_operand.vmem [shape: bf16[4,8,128], index: 3, kind: input, shape index: {}]   ;;  %s1724_s4 = inlined_call_operand.vmem [shape: f32[1,128], index: 4, kind: input, shape index: {}]   ;;  %s1725_s5 = inlined_call_operand.hbm [shape: f32[32,128], index: 5, kind: output, shape index: {}]  }
   0x1   :  { %12 = vsyncpa [#allocation4 + $0x1], 0  ;;  %s1481_s18 = smov 0   ;;  %s1483_s19 = smov 0  }
   0x2   :  { %s1485_s20 = smov 0   ;;  %s1487_s21 = smov 0  }
   0x3 LB: > { %s1150_s22 = sadd.s32 4294967295, %s1444_s21   ;;  %s1151_s23 = sadd.s32 4294967294, %s1444_s21   ;;  %s1444_s21 = sphi %s1487_s21, %s1731_s21   ;;  %s1440_s20 = sphi %s1485_s20, %s1730_s20   ;;  %s1436_s19 = sphi %s1483_s19, %s1729_s19   ;;  %s1432_s18 = sphi %s1481_s18, %s1728_s18  }
   0x4   : > { %s1504_s24 = sadd.s32 1, %s1444_s21   ;;  %s25_s25 = sadd.s32 1, %s1440_s20 }
   0x5   : > { %s22_s26 = ssub.s32 %s1444_s21, %s1504_s24  ;;  %p32_p0 = scmp.ne.s32.totalorder %s1440_s20, %s1436_s19 }
   0x6   : > { %p23_p1 = scmp.eq.s32.totalorder %s22_s26, 0  ;;  %p33_p2 = scmp.eq.s32.totalorder %s1444_s21, 0 }
   0x7   : > { %p146_p3 = scmp.eq.s32.totalorder %s1150_s22, 1  ;;  %p151_p4 = scmp.ne.s32.totalorder %s1436_s19, %s1432_s18 }
   0x8   : > { %s1517_s27 = scalar_select %p23_p1, %s1440_s20, %s25_s25  }
   0x9   : > { %p34_p5 = por %p33_p2, %p32_p0  ;;  %p1519_p6 = por %p146_p3, %p32_p0 }
   0xa   : > { %p152_p7 = scmp.eq.s32.totalorder %s1151_s23, 1  ;;  %p1153_p9 = scmp.ge.s32.totalorder %s1444_s21, 2 }
   0xc   : > { %p1523_p8 = por %p152_p7, %p151_p4  ;;  %180 = sbr.rel (%p1153_p9) target bundleno = 26 (0x1a), region = 32 }
  0x13   : > { %183 = sbr.rel (!%p34_p5) target bundleno = 26 (0x1a), region = 36  ;;  %s185_s30 = sand.u32 (%p34_p5), 1, %s1440_s20  }
  0x14   : > { %s1193_s6 = sshll.u32 (%p34_p5), %s1444_s21, 3  ;;  %s1154_s7 = sshll.u32 (%p34_p5), %s185_s30, 5 }
  0x15   : > { %s190_s10 = scalar_lea.vmem (%p34_p5), %s1720_s0, %s1193_s6  ;;  %s187_s11 = scalar_lea.vmem (%p34_p5), [#allocation2], %s1154_s7 }
  0x16   : > { %v206_v0 = vld [vmem:[%s190_s10] sm:$0xff] (%p34_p5)   ;;  %v210_v1 = vld [vmem:[%s190_s10 + $0x10] sm:$0xff] (%p34_p5)  }
  0x17   : > { %v214_v2 = vld [vmem:[%s190_s10 + $0x20] sm:$0xff] (%p34_p5)   ;;  %207 = vst [vmem:[%s187_s11] sm:$0xff] (%p34_p5), %v206_v0   ;;  %211 = vst [vmem:[%s187_s11 + $0x8] sm:$0xff] (%p34_p5), %v210_v1   ;;  %v218_v3 = vld [vmem:[%s190_s10 + $0x30] sm:$0xff] (%p34_p5)  }
  0x18   : > { %215 = vst [vmem:[%s187_s11 + $0x10] sm:$0xff] (%p34_p5), %v214_v2   ;;  %219 = vst [vmem:[%s187_s11 + $0x18] sm:$0xff] (%p34_p5), %v218_v3  }
  0x1a PF: > { %p1157_p10 = scmp.ge.s32.totalorder %s1444_s21, 1  ;;  %p259_p11 = scmp.lt.s32.totalorder %s1444_s21, 3 }
  0x1c   : > { %p260_p12 = pnand %p1157_p10, %p259_p11 }
  0x1d   : > { %v304_v4 = vld [vmem:[%s1721_s1] sm:$0xf] (!%p260_p12)  ;;  %vm317_vm0 = vcmask (!%p260_p12), 1043456   ;;  %v305_v5 = vld [vmem:[%s1721_s1 + $0x4] sm:$0xf] (!%p260_p12)  ;;  %v1446_v6 = vmov (!%p260_p12), 0.0  }
  0x1e   : > { %263 = sbr.rel (%p260_p12) target bundleno = 873 (0x369), region = 77  ;;  %1223 = vmatprep.subr.bf16.mxu0 (!%p260_p12), %v1446_v6  ;;  %v319_v7 = vsel (!%p260_p12), %vm317_vm0, %v304_v4, 0  ;;  %1229 = vmatprep.subr.bf16.mxu1 (!%p260_p12), %v1446_v6  ;;  %v371_v8 = vsel (!%p260_p12), %vm317_vm0, %v305_v5, 0  ;;  %s1548_s16 = sand.u32 (!%p260_p12), 1, %s1436_s19   ;;  %v306_v9 = vld [vmem:[%s1721_s1 + $0x8] sm:$0xf] (!%p260_p12) }
  0x1f   : > { %1224 = vmatpush3.bf16.msra.mxu0 (!%p260_p12), %v319_v7  ;;  %1230 = vmatpush3.bf16.msra.mxu1 (!%p260_p12), %v371_v8  ;;  %s1158_s17 = sshll.u32 (!%p260_p12), %s1548_s16, 5  ;;  %v307_v10 = vld [vmem:[%s1721_s1 + $0xc] sm:$0xf] (!%p260_p12)  ;;  %vm1447_vm1 = vmmov (!%p260_p12), 0   ;;  %vm313_vm2 = vcmask (!%p260_p12), 64512   ;;  %v423_v12 = vsel (!%p260_p12), %vm317_vm0, %v306_v9, 0 }
  0x20   : > { %1225 = vmatprep.mubr.msk.bf16.mxu0 (!%p260_p12), %vm1447_vm1, %v1446_v6  ;;  %1231 = vmatprep.mubr.msk.bf16.mxu1 (!%p260_p12), %vm1447_vm1, %v1446_v6  ;;  %s268_s6 = scalar_lea.vmem (!%p260_p12), [#allocation2], %s1158_s17  ;;  %v475_v14 = vsel (!%p260_p12), %vm317_vm0, %v307_v10, 0  ;;  %vm518_vm3 = vcmask (!%p260_p12), 261120   ;;  %v1350_v41 = vld [vmem:[%s1722_s2] sm:$0xff] (!%p260_p12)   ;;  %v1351_v42 = vld [vmem:[%s1722_s2 + $0x10] sm:$0xff] (!%p260_p12)   ;;  %v1352_v43 = vld [vmem:[%s1722_s2 + $0x8] sm:$0xff] (!%p260_p12)  }
  0x21   : > { %1235 = vmatprep.subr.bf16.mxu0 (!%p260_p12), %v1446_v6  ;;  %v1346_v11 = vld [vmem:[%s268_s6] sm:$0xff] (!%p260_p12)   ;;  %1241 = vmatprep.subr.bf16.mxu1 (!%p260_p12), %v1446_v6  ;;  %v1347_v13 = vld [vmem:[%s268_s6 + $0x8] sm:$0xff] (!%p260_p12)   ;;  %v1348_v15 = vld [vmem:[%s268_s6 + $0x10] sm:$0xff] (!%p260_p12)   ;;  %s1159_s17 = sshll.u32 (!%p260_p12), %s1548_s16, 4  ;;  %s1070_s10 = scalar_lea.sflag (!%p260_p12), [#allocation4], %s1548_s16 }
  0x22   : > { %1226 = vmatmul.mubr.msk.bf16.vlgmr.msra.gmra.mrb[0].mxu0 (!%p260_p12), %vm313_vm2, %v1346_v11  ;;  %1232 = vmatmul.mubr.msk.bf16.vlgmr.msra.gmra.mrb[0].mxu1 (!%p260_p12), %vm313_vm2, %v1347_v13  ;;  %v1349_v16 = vld [vmem:[%s268_s6 + $0x18] sm:$0xff] (!%p260_p12)   ;;  %v1354_v5 = vld [vmem:[%s1722_s2 + $0x20] sm:$0xff] (!%p260_p12)   ;;  %v1355_v7 = vld [vmem:[%s1722_s2 + $0x30] sm:$0xff] (!%p260_p12)   ;;  %s292_s26 = scalar_lea.vmem (!%p260_p12), [#allocation3], %s1159_s17  ;;  %s1194_s6 = sshll.u32 (!%p260_p12), %s1150_s22, 8 }
  0x23   : > { %1236 = vmatpush3.bf16.msra.mxu0 (!%p260_p12), %v423_v12  ;;  %1242 = vmatpush3.bf16.msra.mxu1 (!%p260_p12), %v475_v14  ;;  %v1353_v44 = vld [vmem:[%s1722_s2 + $0x18] sm:$0xff] (!%p260_p12)   ;;  %v1356_v12 = vld [vmem:[%s1722_s2 + $0x28] sm:$0xff] (!%p260_p12)   ;;  %s1083_s30 = sshll.u32 (!%p260_p12), %s292_s26, 4  ;;  %s1676_s9 = scalar_lea.hbm (!%p260_p12), %s1725_s5, %s1194_s6  ;;  %s1671_s30 = int_to_ptr.vmem [resolvable:$true] %s1083_s30 }
  0x24   : > { %1237 = vmatprep.mubr.msk.bf16.mxu0 (!%p260_p12), %vm1447_vm1, %v1446_v6  ;;  %1243 = vmatprep.mubr.msk.bf16.mxu1 (!%p260_p12), %vm1447_vm1, %v1446_v6  ;;  %v1357_v13 = vld [vmem:[%s1722_s2 + $0x38] sm:$0xff] (!%p260_p12)   ;;  %s1382_s11 = scalar_lea.vmem (!%p260_p12), %s1671_s30, 256  ;;  %s1448_s22 = smov (!%p260_p12), [#allocation3]  }
  0x25   : > { %1247 = vmatprep.subr.bf16.mxu0 %v1446_v6  ;;  %1255 = vmatprep.subr.bf16.mxu1 %v1446_v6  ;;  %p1383_p13 = scmp.ne.s32.totalorder %s1671_s30, %s1382_s11  ;;  %s1386_s12 = sshll.u32 %s1448_s22, 4  ;;  %s1387_s12 = int_to_ptr.vmem [resolvable:$false] %s1386_s12 }
  0x26   : > { %s1388_s13 = scalar_lea.vmem %s1387_s12, 512  ;;  %p1389_p2 = scmp.lt.s32.totalorder %s1671_s30, %s1387_s12 }
  0x27   : > { %p1384_p0 = pnand %p1383_p13, %p1519_p6  ;;  %p1390_p3 = scmp.lt.s32.totalorder %s1388_s13, %s1382_s11 }
  0x29   : > { %p1385_p1 = pneg %p1384_p0  ;;  %p1391_p4 = por %p1390_p3, %p1389_p2 }
  0x2a   : > { %1238 = vmatmul.mubr.msk.bf16.vlgmr.msra.gmra.mrb[4].mxu0 %vm313_vm2, %v1348_v15  ;;  %1244 = vmatmul.mubr.msk.bf16.vlgmr.msra.gmra.mrb[4].mxu1 %vm313_vm2, %v1349_v16 }
  0x2b   : > { %1251 = vmatprep.mubr.msk.bf16.mxu0 %vm1447_vm1, %v1446_v6  ;;  %1259 = vmatprep.mubr.msk.bf16.mxu1 %vm1447_vm1, %v1446_v6  ;;  %p1392_p5 = pnand %p1391_p4, %p1385_p1 }
  0x2c   : > { %1248 = vmatpush3.bf16.msra.mxu0 %v1350_v41  ;;  %1256 = vmatpush3.bf16.msra.mxu1 %v1351_v42 }
  0x2d   : > { %1249 = vmatprep.subr.bf16.mxu0 %v1446_v6  ;;  %1257 = vmatprep.subr.bf16.mxu1 %v1446_v6 }
  0x30   : > { %1250 = vmatpush3.bf16.msra.mxu0 %v1352_v43  ;;  %1258 = vmatpush3.bf16.msra.mxu1 %v1353_v44 }
  0x31   : > { %1263 = vmatprep.subr.bf16.mxu0 %v1446_v6  ;;  %1271 = vmatprep.subr.bf16.mxu1 %v1446_v6 }
  0xf5   : > { %v355_v17 = vpop.f32.mrb[0].mxu0  ;;  %v407_v18 = vpop.f32.mrb[0].mxu1 }
  0xf6   : > { %v1227_v19 = vpop.f32.mrb[1].mxu0  ;;  %v519_v20 = vsel %vm518_vm3, %v355_v17, -inf  ;;  %v1233_v21 = vpop.f32.mrb[1].mxu1  ;;  %v525_v22 = vsel %vm518_vm3, %v407_v18, -inf }
  0xf7   : > { %520 = vmax.xlane.f32.xlu0 %v519_v20  ;;  %v358_v23 = vpop.f32.mrb[2].mxu0  ;;  %526 = vmax.xlane.f32.xlu1 %v525_v22  ;;  %v410_v24 = vpop.f32.mrb[2].mxu1 }
  0xf8   : > { %v1228_v25 = vpop.f32.mrb[3].mxu0  ;;  %v1234_v26 = vpop.f32.mrb[3].mxu1  ;;  %v522_v27 = vsel %vm518_vm3, %v358_v23, -inf  ;;  %v528_v28 = vsel %vm518_vm3, %v410_v24, -inf }
  0xfb   : > { %523 = vmax.xlane.f32.xlu0 %v522_v27  ;;  %529 = vmax.xlane.f32.xlu1 %v528_v28 }
  0xfd   : > { %v459_v29 = vpop.f32.mrb[4].mxu0  ;;  %v511_v31 = vpop.f32.mrb[4].mxu1 }
  0xfe   : > { %v1239_v30 = vpop.f32.mrb[5].mxu0  ;;  %v531_v32 = vsel %vm518_vm3, %v459_v29, -inf  ;;  %v1245_v33 = vpop.f32.mrb[5].mxu1  ;;  %v537_v38 = vsel %vm518_vm3, %v511_v31, -inf }
  0xff   : > { %532 = vmax.xlane.f32.xlu0 %v531_v32  ;;  %v462_v34 = vpop.f32.mrb[6].mxu0  ;;  %v514_v36 = vpop.f32.mrb[6].mxu1  ;;  %v1180_v30 = vld [vmem:[%s1723_s3 + $0x4] sm:$0xf]  ;;  %v859_v32 = vld [vmem:[%s1723_s3] sm:$0xf] }
 0x100   : > { %v1240_v35 = vpop.f32.mrb[7].mxu0  ;;  %v534_v37 = vsel %vm518_vm3, %v462_v34, -inf  ;;  %v1246_v39 = vpop.f32.mrb[7].mxu1  ;;  %v540_v40 = vsel %vm518_vm3, %v514_v36, -inf  ;;  %v913_v33 = vsel %vm317_vm0, %v859_v32, 0 }
 0x101   : > { %535 = vmax.xlane.f32.xlu1 %v534_v37 }
 0x103   : > { %538 = vmax.xlane.f32.xlu0 %v537_v38 }
 0x105   : > { %541 = vmax.xlane.f32.xlu1 %v540_v40 }
 0x184   : > { %v521_v45 = vpop.xlane.xlu0 %520  ;;  %v527_v46 = vpop.xlane.xlu1 %526 }
 0x185   : > { %v543_v48 = vsub.f32 %v355_v17, %v521_v45  ;;  %v545_v51 = vsub.f32 %v407_v18, %v527_v46 }
 0x188   : > { %v524_v47 = vpop.xlane.xlu0 %523  ;;  %v530_v49 = vpop.xlane.xlu1 %529 }
 0x189   : > { %v544_v50 = vsub.f32 %v358_v23, %v524_v47  ;;  %v546_v52 = vsub.f32 %v410_v24, %v530_v49 }
 0x18b   : > { %v551_v53 = vpack.c.bf16 %v544_v50, %v543_v48  ;;  %v552_v54 = vpack.c.bf16 %v546_v52, %v545_v51  ;;  %v1185_v50 = vld [vmem:[%s1723_s3 + $0xc] sm:$0xf] }
 0x18c   : > { %v533_v55 = vpop.xlane.xlu0 %532 }
 0x18d   : > { %v556_v56 = vmul.bf16 1069105081, %v551_v53  ;;  %v559_v57 = vmul.bf16 1069105081, %v552_v54  ;;  %v547_v59 = vsub.f32 %v459_v29, %v533_v55 }
 0x18e   : > { %v536_v58 = vpop.xlane.xlu1 %535 }
 0x18f   : > { %1358 = vpow.bf16 %v556_v56  ;;  %v548_v60 = vsub.f32 %v462_v34, %v536_v58  ;;  %v1183_v56 = vld [vmem:[%s1723_s3 + $0x8] sm:$0xf] }
 0x190   : > { %1360 = vpow.bf16 %v559_v57  ;;  %v539_v61 = vpop.xlane.xlu0 %538 }
 0x191   : > { %v553_v62 = vpack.c.bf16 %v548_v60, %v547_v59  ;;  %v549_v1 = vsub.f32 %v511_v31, %v539_v61  ;;  %v866_v31 = vsel %vm317_vm0, %v1180_v30, 0  ;;  %v1013_v61 = vsel %vm317_vm0, %v1185_v50, 0 }
 0x192   : > { %v542_v63 = vpop.xlane.xlu1 %541 }
 0x193   : > { %v562_v0 = vmul.bf16 1069105081, %v553_v62  ;;  %v550_v2 = vsub.f32 %v514_v36, %v542_v63  ;;  %v962_v63 = vsel %vm317_vm0, %v1183_v56, 0 }
 0x195   : > { %1362 = vpow.bf16 %v562_v0  ;;  %v554_v3 = vpack.c.bf16 %v550_v2, %v549_v1 }
 0x197   : > { %v565_v4 = vmul.bf16 1069105081, %v554_v3 }
 0x199   : > { %1364 = vpow.bf16 %v565_v4 }
 0x19a   : > { %v1359_v8 = vpop.eup %1358 }
 0x19b   : > { %v1361_v9 = vpop.eup %1360  ;;  %1252 = vmatmul.mubr.msk.bf16.vlgmr.msra.gmra.mrb[8].mxu0 %vm518_vm3, %v1359_v8  ;;  %v567_v16 = vunpack.c.l.bf16 %v1359_v8  ;;  %v568_v17 = vunpack.c.h.bf16 %v1359_v8 }
 0x19c   : > { %1260 = vmatmul.mubr.msk.bf16.vlgmr.msra.gmra.mrb[8].mxu1 %vm518_vm3, %v1361_v9  ;;  %1264 = vmatpush3.bf16.msra.mxu0 %v1354_v5  ;;  %v569_v10 = vunpack.c.l.bf16 %v1361_v9  ;;  %v570_v11 = vunpack.c.h.bf16 %v1361_v9 }
 0x19d   : > { %1272 = vmatpush3.bf16.msra.mxu1 %v1355_v7  ;;  %1265 = vmatprep.subr.bf16.mxu0 %v1446_v6  ;;  %v575_v19 = vsel %vm518_vm3, %v567_v16, 0.0  ;;  %v578_v20 = vsel %vm518_vm3, %v568_v17, 0.0 }
 0x19e   : > { %v581_v14 = vsel %vm518_vm3, %v569_v10, 0.0  ;;  %v584_v15 = vsel %vm518_vm3, %v570_v11, 0.0  ;;  %1273 = vmatprep.subr.bf16.mxu1 %v1446_v6  ;;  %1267 = vmatprep.mubr.msk.bf16.mxu0 %vm1447_vm1, %v1446_v6 }
 0x19f   : > { %582 = vadd.xlane.f32.xlu0 %v581_v14  ;;  %585 = vadd.xlane.f32.xlu1 %v584_v15 }
 0x1a0   : > { %v1363_v18 = vpop.eup %1362  ;;  %1266 = vmatpush3.bf16.msra.mxu0 %v1356_v12  ;;  %1275 = vmatprep.mubr.msk.bf16.mxu1 %vm1447_vm1, %v1446_v6 }
 0x1a1   : > { %1274 = vmatpush3.bf16.msra.mxu1 %v1357_v13  ;;  %1279 = vmatprep.subr.bf16.mxu0 %v1446_v6  ;;  %v572_v21 = vunpack.c.h.bf16 %v1363_v18  ;;  %v571_v22 = vunpack.c.l.bf16 %v1363_v18 }
 0x1a2   : > { %1285 = vmatprep.subr.bf16.mxu1 %v1446_v6 }
 0x1a3   : > { %576 = vadd.xlane.f32.xlu0 %v575_v19  ;;  %579 = vadd.xlane.f32.xlu1 %v578_v20  ;;  %v590_v24 = vsel %vm518_vm3, %v572_v21, 0.0  ;;  %v587_v25 = vsel %vm518_vm3, %v571_v22, 0.0 }
 0x1a4   : > { %v1365_v23 = vpop.eup %1364  ;;  %1268 = vmatmul.mubr.msk.bf16.vlgmr.msra.gmra.mrb[12].mxu0 %vm518_vm3, %v1363_v18 }
 0x1a5   : > { %1276 = vmatmul.mubr.msk.bf16.vlgmr.msra.gmra.mrb[12].mxu1 %vm518_vm3, %v1365_v23  ;;  %1281 = vmatprep.mubr.msk.bf16.mxu0 %vm1447_vm1, %v1446_v6  ;;  %v574_v26 = vunpack.c.h.bf16 %v1365_v23  ;;  %v573_v27 = vunpack.c.l.bf16 %v1365_v23 }
 0x1a6   : > { %1287 = vmatprep.mubr.msk.bf16.mxu1 %vm1447_vm1, %v1446_v6  ;;  %1280 = vmatpush3.bf16.msra.mxu0 %v866_v31 }
 0x1a7   : > { %591 = vadd.xlane.f32.xlu1 %v590_v24  ;;  %588 = vadd.xlane.f32.xlu0 %v587_v25  ;;  %v596_v28 = vsel %vm518_vm3, %v574_v26, 0.0  ;;  %v593_v29 = vsel %vm518_vm3, %v573_v27, 0.0 }
 0x1a8   : > { %1291 = vmatprep.subr.bf16.mxu0 %v1446_v6  ;;  %1286 = vmatpush3.bf16.msra.mxu1 %v913_v33  ;;  %v1187_v33 = vld [vmem:[%s1724_s4] ss:$0 sm:$0xff] }
 0x1a9   : > { %1297 = vmatprep.subr.bf16.mxu1 %v1446_v6 }
 0x1ab   : > { %597 = vadd.xlane.f32.xlu1 %v596_v28  ;;  %594 = vadd.xlane.f32.xlu0 %v593_v29 }
 0x22c   : > { %v583_v34 = vpop.xlane.xlu0 %582  ;;  %v586_v35 = vpop.xlane.xlu1 %585 }
 0x22d   : > { %1366 = vrcp.f32 %v583_v34 }
 0x230   : > { %v577_v36 = vpop.xlane.xlu0 %576  ;;  %v580_v37 = vpop.xlane.xlu1 %579 }
 0x231   : > { %1368 = vrcp.f32 %v577_v36 }
 0x232   : > { %1370 = vrcp.f32 %v580_v37 }
 0x233   : > { %1372 = vrcp.f32 %v586_v35 }
 0x234   : > { %v589_v38 = vpop.xlane.xlu0 %588  ;;  %v592_v39 = vpop.xlane.xlu1 %591 }
 0x235   : > { %1374 = vrcp.f32 %v589_v38 }
 0x236   : > { %1376 = vrcp.f32 %v592_v39 }
 0x237   : > { %v1367_v42 = vpop.eup %1366 }
 0x238   : > { %v595_v40 = vpop.xlane.xlu0 %594  ;;  %v598_v41 = vpop.xlane.xlu1 %597 }
 0x239   : > { %1378 = vrcp.f32 %v595_v40 }
 0x23a   : > { %1380 = vrcp.f32 %v598_v41 }
 0x23b   : > { %v1369_v44 = vpop.eup %1368 }
 0x23c   : > { %v1371_v47 = vpop.eup %1370 }
 0x23d   : > { %v1373_v51 = vpop.eup %1372 }
 0x23f   : > { %v1375_v0 = vpop.eup %1374 }
 0x240   : > { %v1377_v2 = vpop.eup %1376 }
 0x243   : > { %v1379_v5 = vpop.eup %1378 }
 0x244   : > { %v1381_v9 = vpop.eup %1380 }
 0x26e   : > { %v672_v43 = vpop.f32.mrb[8].mxu0 }
 0x26f   : > { %v728_v45 = vpop.f32.mrb[8].mxu1  ;;  %v1253_v46 = vpop.f32.mrb[9].mxu0  ;;  %v847_v52 = vmul.f32 %v1369_v44, %v672_v43 }
 0x270   : > { %v1261_v48 = vpop.f32.mrb[9].mxu1  ;;  %v675_v49 = vpop.f32.mrb[10].mxu0  ;;  %v849_v57 = vmul.f32 %v1367_v42, %v728_v45 }
 0x271   : > { %v848_v53 = vmul.f32 %v1371_v47, %v675_v49  ;;  %v731_v54 = vpop.f32.mrb[10].mxu1  ;;  %v1254_v55 = vpop.f32.mrb[11].mxu0 }
 0x272   : > { %v850_v58 = vmul.f32 %v1373_v51, %v731_v54  ;;  %v1262_v59 = vpop.f32.mrb[11].mxu1 }
 0x273   : > { %v855_v60 = vpack.c.bf16 %v848_v53, %v847_v52 }
 0x274   : > { %v856_v62 = vpack.c.bf16 %v850_v58, %v849_v57 }
 0x275   : > { %1288 = vmatmul.mubr.msk.bf16.vlgmr.msra.gmra.mrb[16].mxu1 %vm313_vm2, %v855_v60 }
 0x276   : > { %1282 = vmatmul.mubr.msk.bf16.vlgmr.msra.gmra.mrb[16].mxu0 %vm313_vm2, %v856_v62  ;;  %1298 = vmatpush3.bf16.msra.mxu1 %v1013_v61 }
 0x277   : > { %1292 = vmatpush3.bf16.msra.mxu0 %v962_v63  ;;  %v784_v1 = vpop.f32.mrb[12].mxu0  ;;  %1293 = vmatprep.mubr.msk.bf16.mxu0 %vm1447_vm1, %v1446_v6 }
 0x278   : > { %v1269_v3 = vpop.f32.mrb[13].mxu0  ;;  %v840_v4 = vpop.f32.mrb[12].mxu1  ;;  %1299 = vmatprep.mubr.msk.bf16.mxu1 %vm1447_vm1, %v1446_v6  ;;  %v851_v10 = vmul.f32 %v1375_v0, %v784_v1 }
 0x279   : > { %v787_v7 = vpop.f32.mrb[14].mxu0  ;;  %v1277_v8 = vpop.f32.mrb[13].mxu1  ;;  %v853_v14 = vmul.f32 %v1379_v5, %v840_v4 }
 0x27a   : > { %v852_v11 = vmul.f32 %v1377_v2, %v787_v7  ;;  %v1270_v12 = vpop.f32.mrb[15].mxu0  ;;  %v843_v13 = vpop.f32.mrb[14].mxu1 }
 0x27b   : > { %v854_v15 = vmul.f32 %v1381_v9, %v843_v13  ;;  %v1278_v16 = vpop.f32.mrb[15].mxu1 }
 0x27c   : > { %v857_v17 = vpack.c.bf16 %v852_v11, %v851_v10 }
 0x27d   : > { %v858_v18 = vpack.c.bf16 %v854_v15, %v853_v14 }
 0x27e   : > { %1294 = vmatmul.mubr.msk.bf16.vlgmr.msra.gmra.mrb[20].mxu0 %vm313_vm2, %v857_v17 }
 0x27f   : > { %1300 = vmatmul.mubr.msk.bf16.vlgmr.msra.gmra.mrb[20].mxu1 %vm313_vm2, %v858_v18 }
 0x348   : > { %v949_v19 = vpop.f32.mrb[16].mxu1 }
 0x349   : > { %v902_v6 = vpop.f32.mrb[16].mxu0  ;;  %v1289_v20 = vpop.f32.mrb[17].mxu1 }
 0x34a   : > { %v950_v21 = vadd.f32 %v949_v19, %v902_v6  ;;  %v1283_v22 = vpop.f32.mrb[17].mxu0  ;;  %v952_v23 = vpop.f32.mrb[18].mxu1 }
 0x34b   : > { %v905_v24 = vpop.f32.mrb[18].mxu0  ;;  %v1290_v25 = vpop.f32.mrb[19].mxu1 }
 0x34c   : > { %v953_v26 = vadd.f32 %v952_v23, %v905_v24  ;;  %v1284_v27 = vpop.f32.mrb[19].mxu0 }
 0x351   : > { %v998_v28 = vpop.f32.mrb[20].mxu0 }
 0x352   : > { %v1005_v29 = vadd.f32 %v998_v28, %v950_v21  ;;  %v1295_v30 = vpop.f32.mrb[21].mxu0  ;;  %v1049_v31 = vpop.f32.mrb[20].mxu1 }
 0x353   : > { %v1001_v32 = vpop.f32.mrb[22].mxu0  ;;  %v1301_v34 = vpop.f32.mrb[21].mxu1 }
 0x354   : > { %v1006_v35 = vadd.f32 %v1001_v32, %v953_v26  ;;  %v1056_v36 = vadd.f32 %v1049_v31, %v1005_v29  ;;  %v1296_v37 = vpop.f32.mrb[23].mxu0  ;;  %v1052_v38 = vpop.f32.mrb[22].mxu1 }
 0x355   : > { %v1302_v39 = vpop.f32.mrb[23].mxu1 }
 0x356   : > { %v1065_v40 = vadd.f32 %v1187_v33, %v1056_v36  ;;  %v1057_v41 = vadd.f32 %v1052_v38, %v1006_v35 }
 0x358   : > { %1067 = vst [vmem:[%s292_s26] sm:$0xff] %v1065_v40  ;;  %v1066_v42 = vadd.f32 %v1187_v33, %v1057_v41 }
 0x35a   : > { %1068 = vst [vmem:[%s292_s26 + $0x8] sm:$0xff] %v1066_v42 }
 0x35b   : > { %1395 = shalt.err (!%p1392_p5)
}
 0x35c   : > { %s1396_s14 = scalar_lea.hbm %s1676_s9, 256  ;;  %s1400_s23 = scalar_lea.hbm %s1725_s5, 512 }
 0x35d   : > { %p1397_p7 = scmp.ne.s32.totalorder %s1676_s9, %s1396_s14  ;;  %p1401_p12 = scmp.lt.u32.totalorder %s1676_s9, %s1725_s5 }
 0x35e   : > { %p1402_p13 = scmp.lt.u32.totalorder %s1400_s23, %s1396_s14  ;;  %p1404_p1 = scmp.lt.u32.totalorder %s1396_s14, %s1676_s9 }
 0x35f   : > { %p1398_p10 = pnand %p1397_p7, %p1519_p6 }
 0x360   : > { %p1403_p0 = por %p1402_p13, %p1401_p12 }
 0x361   : > { %p1399_p11 = pneg %p1398_p10 }
 0x362   : > { %p1405_p2 = por %p1404_p1, %p1403_p0 }
 0x364   : > { %p1406_p3 = pnand %p1405_p2, %p1399_p11 }
 0x366   : > { %1409 = shalt.err (!%p1406_p3)
}
 0x367   : > { %s1449_s6 = smov 128   ;;  %s1450_s7 = smov 8  }
 0x368   : > { %1303 = dma.vmem_to_hbm [thread:$0]  (%p1519_p6), %s1671_s30, 256, %s1676_s9, %s1070_s10, %s1449_s6, %s1449_s6, %s1450_s7  }
 0x369 PF: > { %s1098_s8 = sand.u32 1, %s1432_s18   ;;  %p1306_p4 = pnand %p1153_p9, %p1523_p8 }
 0x36a   : > { %s1099_s11 = scalar_lea.sflag [#allocation4], %s1098_s8 }
 0x36b   : > { %1427 = dma.done.wait (!%p1306_p4), %s1099_s11, 256  }
 0x36c   : > { %1429 = vsyncadd (!%p1306_p4), %s1099_s11, 4294967040  ;;  %p15_p5 = scmp.ge.s32.totalorder %s1504_s24, 4   ;;  %s1728_s18 = smov %s1436_s19 }
 0x36d   : > { %s1729_s19 = smov %s1440_s20  ;;  %s1730_s20 = smov %s1517_s27 }
 0x36e   : > { %s1731_s21 = smov %s1504_s24  ;;  %17 = sbr.rel (!%p15_p5) target bundleno = 3 (0x3), region = 124 }
 0x375   :  { %1104 = vsyncpa [#allocation4], 1 }
 0x376   :  { %1106 = vsyncpa [#allocation4 + $0x1], 1 }

// kernel: tpu_custom_call.1
= control target key start
LH: loop header
LB: loop body
LE: loop exit
PB: predicated region body
PF: predicated region fallthrough
CT: control target
= control target key end

     0   :  { %10 = vsyncpa [#allocation4], 0  ;;  %s1724_s0 = inlined_call_operand.vmem [shape: bf16[4,32,8], index: 0, kind: input, shape index: {}]   ;;  %s1725_s1 = inlined_call_operand.vmem [shape: bf16[4,8,32], index: 1, kind: input, shape index: {}]   ;;  %s1726_s2 = inlined_call_operand.vmem [shape: bf16[4,32,8], index: 2, kind: input, shape index: {}]   ;;  %s1727_s3 = inlined_call_operand.vmem [shape: bf16[4,8,128], index: 3, kind: input, shape index: {}]   ;;  %s1728_s4 = inlined_call_operand.vmem [shape: f32[1,128], index: 4, kind: input, shape index: {}]   ;;  %s1729_s5 = inlined_call_operand.hbm [shape: f32[32,128], index: 5, kind: output, shape index: {}]  }
   0x1   :  { %12 = vsyncpa [#allocation4 + $0x1], 0  ;;  %s1485_s18 = smov 0   ;;  %s1487_s19 = smov 0  }
   0x2   :  { %s1489_s20 = smov 0   ;;  %s1491_s21 = smov 0  }
   0x3 LB: > { %s1146_s22 = sadd.s32 4294967295, %s1448_s21   ;;  %s1147_s23 = sadd.s32 4294967294, %s1448_s21   ;;  %s1448_s21 = sphi %s1491_s21, %s1735_s21   ;;  %s1444_s20 = sphi %s1489_s20, %s1734_s20   ;;  %s1440_s19 = sphi %s1487_s19, %s1733_s19   ;;  %s1436_s18 = sphi %s1485_s18, %s1732_s18  }
   0x4   : > { %s1508_s24 = sadd.s32 1, %s1448_s21   ;;  %s25_s25 = sadd.s32 1, %s1444_s20 }
   0x5   : > { %s22_s26 = ssub.s32 %s1448_s21, %s1508_s24  ;;  %p32_p0 = scmp.ne.s32.totalorder %s1444_s20, %s1440_s19 }
   0x6   : > { %p23_p1 = scmp.eq.s32.totalorder %s22_s26, 0  ;;  %p33_p2 = scmp.eq.s32.totalorder %s1448_s21, 0 }
   0x7   : > { %p146_p3 = scmp.eq.s32.totalorder %s1146_s22, 1  ;;  %p151_p4 = scmp.ne.s32.totalorder %s1440_s19, %s1436_s18 }
   0x8   : > { %s1521_s27 = scalar_select %p23_p1, %s1444_s20, %s25_s25  }
   0x9   : > { %p34_p5 = por %p33_p2, %p32_p0  ;;  %p1523_p6 = por %p146_p3, %p32_p0 }
   0xa   : > { %p152_p7 = scmp.eq.s32.totalorder %s1147_s23, 1  ;;  %p1149_p9 = scmp.ge.s32.totalorder %s1448_s21, 2 }
   0xc   : > { %p1527_p8 = por %p152_p7, %p151_p4  ;;  %180 = sbr.rel (%p1149_p9) target bundleno = 26 (0x1a), region = 32 }
  0x13   : > { %183 = sbr.rel (!%p34_p5) target bundleno = 26 (0x1a), region = 36  ;;  %s185_s30 = sand.u32 (%p34_p5), 1, %s1444_s20  }
  0x14   : > { %s1189_s6 = sshll.u32 (%p34_p5), %s1448_s21, 3  ;;  %s1150_s7 = sshll.u32 (%p34_p5), %s185_s30, 5 }
  0x15   : > { %s190_s10 = scalar_lea.vmem (%p34_p5), %s1724_s0, %s1189_s6  ;;  %s187_s11 = scalar_lea.vmem (%p34_p5), [#allocation2], %s1150_s7 }
  0x16   : > { %v206_v0 = vld [vmem:[%s190_s10] sm:$0xff] (%p34_p5)   ;;  %v210_v1 = vld [vmem:[%s190_s10 + $0x10] sm:$0xff] (%p34_p5)  }
  0x17   : > { %v214_v2 = vld [vmem:[%s190_s10 + $0x20] sm:$0xff] (%p34_p5)   ;;  %207 = vst [vmem:[%s187_s11] sm:$0xff] (%p34_p5), %v206_v0   ;;  %211 = vst [vmem:[%s187_s11 + $0x8] sm:$0xff] (%p34_p5), %v210_v1   ;;  %v218_v3 = vld [vmem:[%s190_s10 + $0x30] sm:$0xff] (%p34_p5)  }
  0x18   : > { %215 = vst [vmem:[%s187_s11 + $0x10] sm:$0xff] (%p34_p5), %v214_v2   ;;  %219 = vst [vmem:[%s187_s11 + $0x18] sm:$0xff] (%p34_p5), %v218_v3  }
  0x1a PF: > { %p1153_p10 = scmp.ge.s32.totalorder %s1448_s21, 1  ;;  %p259_p11 = scmp.lt.s32.totalorder %s1448_s21, 3 }
  0x1c   : > { %p260_p12 = pnand %p1153_p10, %p259_p11 }
  0x1d   : > { %v304_v4 = vld [vmem:[%s1725_s1] sm:$0xf] (!%p260_p12)  ;;  %vm317_vm0 = vcmask (!%p260_p12), 1043456   ;;  %v305_v5 = vld [vmem:[%s1725_s1 + $0x4] sm:$0xf] (!%p260_p12)  ;;  %v1450_v6 = vmov (!%p260_p12), 0.0  }
  0x1e   : > { %263 = sbr.rel (%p260_p12) target bundleno = 872 (0x368), region = 77  ;;  %1219 = vmatprep.subr.bf16.mxu0 (!%p260_p12), %v1450_v6  ;;  %v319_v7 = vsel (!%p260_p12), %vm317_vm0, %v304_v4, 0  ;;  %1225 = vmatprep.subr.bf16.mxu1 (!%p260_p12), %v1450_v6  ;;  %v371_v8 = vsel (!%p260_p12), %vm317_vm0, %v305_v5, 0  ;;  %s1552_s16 = sand.u32 (!%p260_p12), 1, %s1440_s19   ;;  %v306_v9 = vld [vmem:[%s1725_s1 + $0x8] sm:$0xf] (!%p260_p12) }
  0x1f   : > { %1220 = vmatpush3.bf16.msra.mxu0 (!%p260_p12), %v319_v7  ;;  %1226 = vmatpush3.bf16.msra.mxu1 (!%p260_p12), %v371_v8  ;;  %s1154_s17 = sshll.u32 (!%p260_p12), %s1552_s16, 5  ;;  %v307_v10 = vld [vmem:[%s1725_s1 + $0xc] sm:$0xf] (!%p260_p12)  ;;  %vm1451_vm1 = vmmov (!%p260_p12), 0   ;;  %vm313_vm2 = vcmask (!%p260_p12), 64512   ;;  %v423_v12 = vsel (!%p260_p12), %vm317_vm0, %v306_v9, 0 }
  0x20   : > { %1221 = vmatprep.mubr.msk.bf16.mxu0 (!%p260_p12), %vm1451_vm1, %v1450_v6  ;;  %1227 = vmatprep.mubr.msk.bf16.mxu1 (!%p260_p12), %vm1451_vm1, %v1450_v6  ;;  %s268_s6 = scalar_lea.vmem (!%p260_p12), [#allocation2], %s1154_s17  ;;  %v475_v14 = vsel (!%p260_p12), %vm317_vm0, %v307_v10, 0  ;;  %vm518_vm3 = vcmask (!%p260_p12), 261120   ;;  %v1346_v41 = vld [vmem:[%s1726_s2] sm:$0xff] (!%p260_p12)   ;;  %v1347_v42 = vld [vmem:[%s1726_s2 + $0x10] sm:$0xff] (!%p260_p12)   ;;  %v1348_v43 = vld [vmem:[%s1726_s2 + $0x8] sm:$0xff] (!%p260_p12)  }
  0x21   : > { %1231 = vmatprep.subr.bf16.mxu0 (!%p260_p12), %v1450_v6  ;;  %v1342_v11 = vld [vmem:[%s268_s6] sm:$0xff] (!%p260_p12)   ;;  %1237 = vmatprep.subr.bf16.mxu1 (!%p260_p12), %v1450_v6  ;;  %v1343_v13 = vld [vmem:[%s268_s6 + $0x8] sm:$0xff] (!%p260_p12)   ;;  %v1344_v15 = vld [vmem:[%s268_s6 + $0x10] sm:$0xff] (!%p260_p12)   ;;  %s1155_s17 = sshll.u32 (!%p260_p12), %s1552_s16, 4  ;;  %s1066_s10 = scalar_lea.sflag (!%p260_p12), [#allocation4], %s1552_s16 }
  0x22   : > { %1222 = vmatmul.mubr.msk.bf16.vlgmr.msra.gmra.mrb[0].mxu0 (!%p260_p12), %vm313_vm2, %v1342_v11  ;;  %1228 = vmatmul.mubr.msk.bf16.vlgmr.msra.gmra.mrb[0].mxu1 (!%p260_p12), %vm313_vm2, %v1343_v13  ;;  %v1345_v16 = vld [vmem:[%s268_s6 + $0x18] sm:$0xff] (!%p260_p12)   ;;  %v1351_v13 = vld [vmem:[%s1726_s2 + $0x30] sm:$0xff] (!%p260_p12)   ;;  %s292_s26 = scalar_lea.vmem (!%p260_p12), [#allocation3], %s1155_s17  ;;  %s1190_s6 = sshll.u32 (!%p260_p12), %s1146_s22, 8 }
  0x23   : > { %1232 = vmatpush3.bf16.msra.mxu0 (!%p260_p12), %v423_v12  ;;  %1238 = vmatpush3.bf16.msra.mxu1 (!%p260_p12), %v475_v14  ;;  %v1349_v44 = vld [vmem:[%s1726_s2 + $0x18] sm:$0xff] (!%p260_p12)   ;;  %v1350_v12 = vld [vmem:[%s1726_s2 + $0x20] sm:$0xff] (!%p260_p12)   ;;  %s1079_s30 = sshll.u32 (!%p260_p12), %s292_s26, 4  ;;  %s1680_s9 = scalar_lea.hbm (!%p260_p12), %s1729_s5, %s1190_s6  ;;  %s1675_s30 = int_to_ptr.vmem [resolvable:$true] %s1079_s30 }
  0x24   : > { %1233 = vmatprep.mubr.msk.bf16.mxu0 (!%p260_p12), %vm1451_vm1, %v1450_v6  ;;  %1239 = vmatprep.mubr.msk.bf16.mxu1 (!%p260_p12), %vm1451_vm1, %v1450_v6  ;;  %s1386_s11 = scalar_lea.vmem (!%p260_p12), %s1675_s30, 256  ;;  %s1452_s22 = smov (!%p260_p12), [#allocation3]  }
  0x25   : > { %1243 = vmatprep.subr.bf16.mxu0 %v1450_v6  ;;  %1251 = vmatprep.subr.bf16.mxu1 %v1450_v6  ;;  %p1387_p13 = scmp.ne.s32.totalorder %s1675_s30, %s1386_s11  ;;  %s1390_s12 = sshll.u32 %s1452_s22, 4  ;;  %s1391_s12 = int_to_ptr.vmem [resolvable:$false] %s1390_s12 }
  0x26   : > { %s1392_s13 = scalar_lea.vmem %s1391_s12, 512  ;;  %p1393_p2 = scmp.lt.s32.totalorder %s1675_s30, %s1391_s12 }
  0x27   : > { %p1388_p0 = pnand %p1387_p13, %p1523_p6  ;;  %p1394_p3 = scmp.lt.s32.totalorder %s1392_s13, %s1386_s11 }
  0x29   : > { %p1389_p1 = pneg %p1388_p0  ;;  %p1395_p4 = por %p1394_p3, %p1393_p2 }
  0x2a   : > { %1234 = vmatmul.mubr.msk.bf16.vlgmr.msra.gmra.mrb[4].mxu0 %vm313_vm2, %v1344_v15  ;;  %1240 = vmatmul.mubr.msk.bf16.vlgmr.msra.gmra.mrb[4].mxu1 %vm313_vm2, %v1345_v16 }
  0x2b   : > { %1247 = vmatprep.mubr.msk.bf16.mxu0 %vm1451_vm1, %v1450_v6  ;;  %1255 = vmatprep.mubr.msk.bf16.mxu1 %vm1451_vm1, %v1450_v6  ;;  %p1396_p5 = pnand %p1395_p4, %p1389_p1 }
  0x2c   : > { %1244 = vmatpush3.bf16.msra.mxu0 %v1346_v41  ;;  %1252 = vmatpush3.bf16.msra.mxu1 %v1347_v42 }
  0x2d   : > { %1245 = vmatprep.subr.bf16.mxu0 %v1450_v6  ;;  %1253 = vmatprep.subr.bf16.mxu1 %v1450_v6 }
  0x30   : > { %1246 = vmatpush3.bf16.msra.mxu0 %v1348_v43  ;;  %1254 = vmatpush3.bf16.msra.mxu1 %v1349_v44 }
  0x31   : > { %1259 = vmatprep.subr.bf16.mxu0 %v1450_v6  ;;  %1267 = vmatprep.subr.bf16.mxu1 %v1450_v6 }
  0xf5   : > { %v355_v17 = vpop.f32.mrb[0].mxu0  ;;  %v407_v18 = vpop.f32.mrb[0].mxu1 }
  0xf6   : > { %v1223_v19 = vpop.f32.mrb[1].mxu0  ;;  %v519_v20 = vsel %vm518_vm3, %v355_v17, -inf  ;;  %v1229_v21 = vpop.f32.mrb[1].mxu1  ;;  %v525_v22 = vsel %vm518_vm3, %v407_v18, -inf }
  0xf7   : > { %520 = vmax.xlane.f32.xlu0 %v519_v20  ;;  %v358_v23 = vpop.f32.mrb[2].mxu0  ;;  %526 = vmax.xlane.f32.xlu1 %v525_v22  ;;  %v410_v24 = vpop.f32.mrb[2].mxu1  ;;  %v1352_v19 = vld [vmem:[%s1726_s2 + $0x28] sm:$0xff]   ;;  %v1353_v20 = vld [vmem:[%s1726_s2 + $0x38] sm:$0xff]  }
  0xf8   : > { %v1224_v25 = vpop.f32.mrb[3].mxu0  ;;  %v1230_v26 = vpop.f32.mrb[3].mxu1  ;;  %v522_v27 = vsel %vm518_vm3, %v358_v23, -inf  ;;  %v528_v28 = vsel %vm518_vm3, %v410_v24, -inf }
  0xfb   : > { %523 = vmax.xlane.f32.xlu0 %v522_v27  ;;  %529 = vmax.xlane.f32.xlu1 %v528_v28 }
  0xfd   : > { %v459_v29 = vpop.f32.mrb[4].mxu0  ;;  %v511_v31 = vpop.f32.mrb[4].mxu1 }
  0xfe   : > { %v1235_v30 = vpop.f32.mrb[5].mxu0  ;;  %v531_v32 = vsel %vm518_vm3, %v459_v29, -inf  ;;  %v1241_v33 = vpop.f32.mrb[5].mxu1  ;;  %v537_v38 = vsel %vm518_vm3, %v511_v31, -inf }
  0xff   : > { %532 = vmax.xlane.f32.xlu0 %v531_v32  ;;  %v462_v34 = vpop.f32.mrb[6].mxu0  ;;  %v514_v36 = vpop.f32.mrb[6].mxu1  ;;  %v1176_v30 = vld [vmem:[%s1727_s3 + $0x4] sm:$0xf]  ;;  %v855_v32 = vld [vmem:[%s1727_s3] sm:$0xf] }
 0x100   : > { %v1236_v35 = vpop.f32.mrb[7].mxu0  ;;  %v534_v37 = vsel %vm518_vm3, %v462_v34, -inf  ;;  %v1242_v39 = vpop.f32.mrb[7].mxu1  ;;  %v540_v40 = vsel %vm518_vm3, %v514_v36, -inf  ;;  %v909_v33 = vsel %vm317_vm0, %v855_v32, 0 }
 0x101   : > { %535 = vmax.xlane.f32.xlu1 %v534_v37 }
 0x103   : > { %538 = vmax.xlane.f32.xlu0 %v537_v38 }
 0x105   : > { %541 = vmax.xlane.f32.xlu1 %v540_v40 }
 0x184   : > { %v521_v45 = vpop.xlane.xlu0 %520  ;;  %v527_v46 = vpop.xlane.xlu1 %526 }
 0x185   : > { %v543_v47 = vsub.f32 %v355_v17, %v521_v45  ;;  %v545_v48 = vsub.f32 %v407_v18, %v527_v46 }
 0x187   : > { %v555_v49 = vmul.f32 1.442695, %v545_v48  ;;  %v551_v50 = vmul.f32 1.442695, %v543_v47 }
 0x188   : > { %v524_v51 = vpop.xlane.xlu0 %523  ;;  %v530_v52 = vpop.xlane.xlu1 %529 }
 0x189   : > { %v544_v53 = vsub.f32 %v358_v23, %v524_v51  ;;  %1354 = vpow2.f32 %v555_v49  ;;  %v546_v54 = vsub.f32 %v410_v24, %v530_v52  ;;  %v1179_v52 = vld [vmem:[%s1727_s3 + $0x8] sm:$0xf] }
 0x18a   : > { %1356 = vpow2.f32 %v551_v50 }
 0x18b   : > { %v553_v55 = vmul.f32 1.442695, %v544_v53  ;;  %v557_v56 = vmul.f32 1.442695, %v546_v54  ;;  %v1181_v53 = vld [vmem:[%s1727_s3 + $0xc] sm:$0xf] }
 0x18c   : > { %v533_v57 = vpop.xlane.xlu0 %532 }
 0x18d   : > { %1358 = vpow2.f32 %v553_v55  ;;  %v547_v58 = vsub.f32 %v459_v29, %v533_v57 }
 0x18e   : > { %1360 = vpow2.f32 %v557_v56  ;;  %v536_v59 = vpop.xlane.xlu1 %535 }
 0x18f   : > { %v559_v60 = vmul.f32 1.442695, %v547_v58  ;;  %v548_v61 = vsub.f32 %v462_v34, %v536_v59 }
 0x190   : > { %v539_v62 = vpop.xlane.xlu0 %538 }
 0x191   : > { %1362 = vpow2.f32 %v559_v60  ;;  %v561_v63 = vmul.f32 1.442695, %v548_v61  ;;  %v549_v0 = vsub.f32 %v511_v31, %v539_v62  ;;  %v862_v31 = vsel %vm317_vm0, %v1176_v30, 0 }
 0x192   : > { %v542_v1 = vpop.xlane.xlu1 %541  ;;  %v958_v62 = vsel %vm317_vm0, %v1179_v52, 0 }
 0x193   : > { %1364 = vpow2.f32 %v561_v63  ;;  %v563_v2 = vmul.f32 1.442695, %v549_v0  ;;  %v550_v3 = vsub.f32 %v514_v36, %v542_v1  ;;  %v1355_v4 = vpop.eup %1354  ;;  %v1009_v63 = vsel %vm317_vm0, %v1181_v53, 0 }
 0x194   : > { %v573_v7 = vsel %vm518_vm3, %v1355_v4, 0.0  ;;  %v1357_v8 = vpop.eup %1356 }
 0x195   : > { %1366 = vpow2.f32 %v563_v2  ;;  %v565_v5 = vmul.f32 1.442695, %v550_v3  ;;  %574 = vadd.xlane.f32.xlu0 %v573_v7  ;;  %v567_v14 = vsel %vm518_vm3, %v1357_v8, 0.0 }
 0x197   : > { %v1359_v9 = vpop.eup %1358  ;;  %1368 = vpow2.f32 %v565_v5 }
 0x198   : > { %v1361_v10 = vpop.eup %1360  ;;  %v591_v11 = vpack.c.bf16 %v1359_v9, %v1357_v8  ;;  %v570_v22 = vsel %vm518_vm3, %v1359_v9, 0.0 }
 0x199   : > { %v576_v15 = vsel %vm518_vm3, %v1361_v10, 0.0  ;;  %v592_v16 = vpack.c.bf16 %v1361_v10, %v1355_v4  ;;  %568 = vadd.xlane.f32.xlu0 %v567_v14 }
 0x19a   : > { %577 = vadd.xlane.f32.xlu1 %v576_v15  ;;  %1248 = vmatmul.mubr.msk.bf16.vlgmr.msra.gmra.mrb[8].mxu0 %vm518_vm3, %v591_v11 }
 0x19b   : > { %v1363_v17 = vpop.eup %1362  ;;  %1256 = vmatmul.mubr.msk.bf16.vlgmr.msra.gmra.mrb[8].mxu1 %vm518_vm3, %v592_v16  ;;  %1260 = vmatpush3.bf16.msra.mxu0 %v1350_v12 }
 0x19c   : > { %1268 = vmatpush3.bf16.msra.mxu1 %v1351_v13  ;;  %v579_v18 = vsel %vm518_vm3, %v1363_v17, 0.0  ;;  %1261 = vmatprep.subr.bf16.mxu0 %v1450_v6 }
 0x19d   : > { %v1365_v21 = vpop.eup %1364  ;;  %1269 = vmatprep.subr.bf16.mxu1 %v1450_v6  ;;  %580 = vadd.xlane.f32.xlu0 %v579_v18 }
 0x19e   : > { %571 = vadd.xlane.f32.xlu1 %v570_v22  ;;  %v593_v23 = vpack.c.bf16 %v1365_v21, %v1363_v17  ;;  %1263 = vmatprep.mubr.msk.bf16.mxu0 %vm1451_vm1, %v1450_v6  ;;  %v582_v27 = vsel %vm518_vm3, %v1365_v21, 0.0 }
 0x19f   : > { %v1367_v24 = vpop.eup %1366  ;;  %1271 = vmatprep.mubr.msk.bf16.mxu1 %vm1451_vm1, %v1450_v6  ;;  %1262 = vmatpush3.bf16.msra.mxu0 %v1352_v19 }
 0x1a0   : > { %1270 = vmatpush3.bf16.msra.mxu1 %v1353_v20  ;;  %v585_v25 = vsel %vm518_vm3, %v1367_v24, 0.0  ;;  %1275 = vmatprep.subr.bf16.mxu0 %v1450_v6 }
 0x1a1   : > { %v1369_v26 = vpop.eup %1368  ;;  %1281 = vmatprep.subr.bf16.mxu1 %v1450_v6  ;;  %586 = vadd.xlane.f32.xlu0 %v585_v25 }
 0x1a2   : > { %583 = vadd.xlane.f32.xlu1 %v582_v27  ;;  %v594_v28 = vpack.c.bf16 %v1369_v26, %v1367_v24  ;;  %1264 = vmatmul.mubr.msk.bf16.vlgmr.msra.gmra.mrb[12].mxu0 %vm518_vm3, %v593_v23  ;;  %v588_v29 = vsel %vm518_vm3, %v1369_v26, 0.0 }
 0x1a3   : > { %1277 = vmatprep.mubr.msk.bf16.mxu0 %vm1451_vm1, %v1450_v6  ;;  %1276 = vmatpush3.bf16.msra.mxu0 %v862_v31 }
 0x1a4   : > { %1272 = vmatmul.mubr.msk.bf16.vlgmr.msra.gmra.mrb[12].mxu1 %vm518_vm3, %v594_v28  ;;  %1287 = vmatprep.subr.bf16.mxu0 %v1450_v6 }
 0x1a5   : > { %1283 = vmatprep.mubr.msk.bf16.mxu1 %vm1451_vm1, %v1450_v6  ;;  %1282 = vmatpush3.bf16.msra.mxu1 %v909_v33  ;;  %v1183_v33 = vld [vmem:[%s1728_s4] ss:$0 sm:$0xff] }
 0x1a6   : > { %589 = vadd.xlane.f32.xlu1 %v588_v29  ;;  %1293 = vmatprep.subr.bf16.mxu1 %v1450_v6 }
 0x222   : > { %v575_v34 = vpop.xlane.xlu0 %574 }
 0x223   : > { %1370 = vrcp.f32 %v575_v34 }
 0x226   : > { %v569_v36 = vpop.xlane.xlu0 %568 }
 0x227   : > { %v578_v35 = vpop.xlane.xlu1 %577  ;;  %1372 = vrcp.f32 %v569_v36 }
 0x228   : > { %1374 = vrcp.f32 %v578_v35 }
 0x22a   : > { %v581_v38 = vpop.xlane.xlu0 %580 }
 0x22b   : > { %v572_v37 = vpop.xlane.xlu1 %571 }
 0x22c   : > { %1376 = vrcp.f32 %v572_v37 }
 0x22d   : > { %1378 = vrcp.f32 %v581_v38  ;;  %v1371_v42 = vpop.eup %1370 }
 0x22e   : > { %v587_v40 = vpop.xlane.xlu0 %586 }
 0x22f   : > { %v584_v39 = vpop.xlane.xlu1 %583  ;;  %1380 = vrcp.f32 %v587_v40 }
 0x230   : > { %1382 = vrcp.f32 %v584_v39 }
 0x231   : > { %v1373_v43 = vpop.eup %1372 }
 0x232   : > { %v1375_v46 = vpop.eup %1374 }
 0x233   : > { %v590_v41 = vpop.xlane.xlu1 %589 }
 0x234   : > { %1384 = vrcp.f32 %v590_v41 }
 0x236   : > { %v1377_v49 = vpop.eup %1376 }
 0x237   : > { %v1379_v0 = vpop.eup %1378 }
 0x239   : > { %v1381_v2 = vpop.eup %1380 }
 0x23a   : > { %v1383_v5 = vpop.eup %1382 }
 0x23e   : > { %v1385_v9 = vpop.eup %1384 }
 0x26d   : > { %v668_v44 = vpop.f32.mrb[8].mxu0 }
 0x26e   : > { %v724_v45 = vpop.f32.mrb[8].mxu1  ;;  %v1249_v47 = vpop.f32.mrb[9].mxu0  ;;  %v843_v54 = vmul.f32 %v1373_v43, %v668_v44 }
 0x26f   : > { %v1257_v48 = vpop.f32.mrb[9].mxu1  ;;  %v671_v50 = vpop.f32.mrb[10].mxu0  ;;  %v845_v55 = vmul.f32 %v1371_v42, %v724_v45 }
 0x270   : > { %v727_v51 = vpop.f32.mrb[10].mxu1  ;;  %v844_v56 = vmul.f32 %v1377_v49, %v671_v50  ;;  %v1250_v58 = vpop.f32.mrb[11].mxu0 }
 0x271   : > { %v846_v57 = vmul.f32 %v1375_v46, %v727_v51  ;;  %v1258_v59 = vpop.f32.mrb[11].mxu1 }
 0x272   : > { %v851_v60 = vpack.c.bf16 %v844_v56, %v843_v54 }
 0x273   : > { %v852_v61 = vpack.c.bf16 %v846_v57, %v845_v55 }
 0x274   : > { %1284 = vmatmul.mubr.msk.bf16.vlgmr.msra.gmra.mrb[16].mxu1 %vm313_vm2, %v851_v60 }
 0x275   : > { %1278 = vmatmul.mubr.msk.bf16.vlgmr.msra.gmra.mrb[16].mxu0 %vm313_vm2, %v852_v61  ;;  %v780_v1 = vpop.f32.mrb[12].mxu0  ;;  %1294 = vmatpush3.bf16.msra.mxu1 %v1009_v63 }
 0x276   : > { %1288 = vmatpush3.bf16.msra.mxu0 %v958_v62  ;;  %v1265_v3 = vpop.f32.mrb[13].mxu0  ;;  %1289 = vmatprep.mubr.msk.bf16.mxu0 %vm1451_vm1, %v1450_v6  ;;  %v847_v10 = vmul.f32 %v1379_v0, %v780_v1 }
 0x277   : > { %v836_v4 = vpop.f32.mrb[12].mxu1  ;;  %1295 = vmatprep.mubr.msk.bf16.mxu1 %vm1451_vm1, %v1450_v6  ;;  %v783_v7 = vpop.f32.mrb[14].mxu0 }
 0x278   : > { %v1273_v8 = vpop.f32.mrb[13].mxu1  ;;  %v848_v11 = vmul.f32 %v1383_v5, %v783_v7  ;;  %v1266_v12 = vpop.f32.mrb[15].mxu0  ;;  %v849_v14 = vmul.f32 %v1381_v2, %v836_v4 }
 0x279   : > { %v839_v13 = vpop.f32.mrb[14].mxu1 }
 0x27a   : > { %v850_v15 = vmul.f32 %v1385_v9, %v839_v13  ;;  %v1274_v16 = vpop.f32.mrb[15].mxu1  ;;  %v853_v17 = vpack.c.bf16 %v848_v11, %v847_v10 }
 0x27c   : > { %v854_v18 = vpack.c.bf16 %v850_v15, %v849_v14 }
 0x27d   : > { %1290 = vmatmul.mubr.msk.bf16.vlgmr.msra.gmra.mrb[20].mxu0 %vm313_vm2, %v853_v17 }
 0x27e   : > { %1296 = vmatmul.mubr.msk.bf16.vlgmr.msra.gmra.mrb[20].mxu1 %vm313_vm2, %v854_v18 }
 0x347   : > { %v945_v6 = vpop.f32.mrb[16].mxu1 }
 0x348   : > { %v898_v19 = vpop.f32.mrb[16].mxu0  ;;  %v1285_v22 = vpop.f32.mrb[17].mxu1 }
 0x349   : > { %v946_v20 = vadd.f32 %v945_v6, %v898_v19  ;;  %v1279_v21 = vpop.f32.mrb[17].mxu0  ;;  %v948_v24 = vpop.f32.mrb[18].mxu1 }
 0x34a   : > { %v901_v23 = vpop.f32.mrb[18].mxu0  ;;  %v1286_v27 = vpop.f32.mrb[19].mxu1 }
 0x34b   : > { %v949_v25 = vadd.f32 %v948_v24, %v901_v23  ;;  %v1280_v26 = vpop.f32.mrb[19].mxu0 }
 0x350   : > { %v994_v28 = vpop.f32.mrb[20].mxu0 }
 0x351   : > { %v1001_v29 = vadd.f32 %v994_v28, %v946_v20  ;;  %v1291_v30 = vpop.f32.mrb[21].mxu0  ;;  %v1045_v31 = vpop.f32.mrb[20].mxu1 }
 0x352   : > { %v997_v32 = vpop.f32.mrb[22].mxu0  ;;  %v1297_v34 = vpop.f32.mrb[21].mxu1 }
 0x353   : > { %v1002_v35 = vadd.f32 %v997_v32, %v949_v25  ;;  %v1052_v36 = vadd.f32 %v1045_v31, %v1001_v29  ;;  %v1292_v37 = vpop.f32.mrb[23].mxu0  ;;  %v1048_v38 = vpop.f32.mrb[22].mxu1 }
 0x354   : > { %v1298_v39 = vpop.f32.mrb[23].mxu1 }
 0x355   : > { %v1061_v40 = vadd.f32 %v1183_v33, %v1052_v36  ;;  %v1053_v41 = vadd.f32 %v1048_v38, %v1002_v35 }
 0x357   : > { %1063 = vst [vmem:[%s292_s26] sm:$0xff] %v1061_v40  ;;  %v1062_v42 = vadd.f32 %v1183_v33, %v1053_v41 }
 0x359   : > { %1064 = vst [vmem:[%s292_s26 + $0x8] sm:$0xff] %v1062_v42 }
 0x35a   : > { %1399 = shalt.err (!%p1396_p5)
}
 0x35b   : > { %s1400_s14 = scalar_lea.hbm %s1680_s9, 256  ;;  %s1404_s23 = scalar_lea.hbm %s1729_s5, 512 }
 0x35c   : > { %p1401_p7 = scmp.ne.s32.totalorder %s1680_s9, %s1400_s14  ;;  %p1405_p12 = scmp.lt.u32.totalorder %s1680_s9, %s1729_s5 }
 0x35d   : > { %p1406_p13 = scmp.lt.u32.totalorder %s1404_s23, %s1400_s14  ;;  %p1408_p1 = scmp.lt.u32.totalorder %s1400_s14, %s1680_s9 }
 0x35e   : > { %p1402_p10 = pnand %p1401_p7, %p1523_p6 }
 0x35f   : > { %p1407_p0 = por %p1406_p13, %p1405_p12 }
 0x360   : > { %p1403_p11 = pneg %p1402_p10 }
 0x361   : > { %p1409_p2 = por %p1408_p1, %p1407_p0 }
 0x363   : > { %p1410_p3 = pnand %p1409_p2, %p1403_p11 }
 0x365   : > { %1413 = shalt.err (!%p1410_p3)
}
 0x366   : > { %s1453_s6 = smov 128   ;;  %s1454_s7 = smov 8  }
 0x367   : > { %1299 = dma.vmem_to_hbm [thread:$0]  (%p1523_p6), %s1675_s30, 256, %s1680_s9, %s1066_s10, %s1453_s6, %s1453_s6, %s1454_s7  }
 0x368 PF: > { %s1094_s8 = sand.u32 1, %s1436_s18   ;;  %p1302_p4 = pnand %p1149_p9, %p1527_p8 }
 0x369   : > { %s1095_s11 = scalar_lea.sflag [#allocation4], %s1094_s8 }
 0x36a   : > { %1431 = dma.done.wait (!%p1302_p4), %s1095_s11, 256  }
 0x36b   : > { %1433 = vsyncadd (!%p1302_p4), %s1095_s11, 4294967040  ;;  %p15_p5 = scmp.ge.s32.totalorder %s1508_s24, 4   ;;  %s1732_s18 = smov %s1440_s19 }
 0x36c   : > { %s1733_s19 = smov %s1444_s20  ;;  %s1734_s20 = smov %s1521_s27 }
 0x36d   : > { %s1735_s21 = smov %s1508_s24  ;;  %17 = sbr.rel (!%p15_p5) target bundleno = 3 (0x3), region = 124 }
 0x374   :  { %1100 = vsyncpa [#allocation4], 1 }
 0x375   :  { %1102 = vsyncpa [#allocation4 + $0x1], 1 }

</bundles_post_ra>
